<compile_context>
chip_gen: v6e
topology: v6e:2x2x1
jax: 0.10.0
libtpu: 0.0.40
codegen_flags: <defaults>
</compile_context>

<pallas_src>
import functools

import jax
import jax.numpy as jnp
from jax import lax
from jax.experimental import pallas as pl
from jax.experimental.pallas import tpu as pltpu


def _reorder_gates(w, hidden):
    """Re-pack the trailing 4H axis from PyTorch's [i, f, g, o] to [i, f, o, g]."""
    H = hidden
    return jnp.concatenate(
        [w[..., 0 * H:1 * H],      # i
         w[..., 1 * H:2 * H],      # f
         w[..., 3 * H:4 * H],      # o
         w[..., 2 * H:3 * H]],     # g
        axis=-1)


def _lstm_kernel(emb_ref, w_ih_ref, w_hh_ref, b_ref, enc_ref,
                 seq_buf, gpre_buf, *, num_layers, hidden, seq_len,
                 batch_blk, mxu_dtype, unroll):
    """Stacked-LSTM recurrence for one batch block, layer-outer / time-inner.

    emb_ref:  (T, Bb, H)    time-major embedded inputs (mxu_dtype)
    w_ih_ref: (L, H, 4H)    pre-transposed input weights, gate order [i,f,o,g]
    w_hh_ref: (L, H, 4H)    pre-transposed recurrent weights, [i,f,o,g]
    b_ref:    (L, 1, 4H)    b_ih + b_hh, [i,f,o,g]  (f32)
    enc_ref:  (T, Bb, H)    time-major top-layer outputs (f32)
    seq_buf:  (T, Bb, H)    VMEM buffer for intermediate layer outputs
    gpre_buf: (T, Bb, 4H)   VMEM buffer for the hoisted input-side gate projection
    """
    L, H, T, Bb = num_layers, hidden, seq_len, batch_blk
    f32 = jnp.float32

    for l in range(L):                                    # static layer-outer loop
        in_ref = emb_ref if l == 0 else seq_buf
        out_ref = enc_ref if l == L - 1 else seq_buf

        # Weights / bias for this layer loaded ONCE (resident across the T loops).
        w_ih_l = w_ih_ref[l]                              # (H, 4H)
        w_hh_l = w_hh_ref[l]                              # (H, 4H)
        b_l = jnp.broadcast_to(b_ref[l], (Bb, 4 * H))     # hoisted bias broadcast

        # ---- phase 1: non-recurrent input-side projection, off the sequential
        # chain.  T independent MXU matmuls (no h dependence, no lane concat).
        def proj_step(t, carry):
            x_t = in_ref[t].astype(mxu_dtype)             # (Bb, H)
            gpre_buf[t] = (jnp.dot(x_t, w_ih_l,
                                   preferred_element_type=f32) + b_l)
            return carry

        lax.fori_loop(0, T, proj_step, 0, unroll=unroll)

        # ---- phase 2: sequential recurrence — only h_prev @ W_hh per step.
        def rec_step(t, carry):
            h_prev, c_prev = carry
            gates = gpre_buf[t] + jnp.dot(h_prev.astype(mxu_dtype), w_hh_l,
                                          preferred_element_type=f32)  # (Bb, 4H)
            sig = jax.nn.sigmoid(gates[:, :3 * H])        # one contiguous slice
            g_g = jnp.tanh(gates[:, 3 * H:])              # one contiguous slice
            i_g = sig[:, 0 * H:1 * H]
            f_g = sig[:, 1 * H:2 * H]
            o_g = sig[:, 2 * H:3 * H]
            c_new = f_g * c_prev + i_g * g_g
            h_new = o_g * jnp.tanh(c_new)
            out_ref[t] = h_new.astype(out_ref.dtype)
            return h_new, c_new

        h0 = jnp.zeros((Bb, H), f32)
        lax.fori_loop(0, T, rec_step, (h0, h0), unroll=unroll)


def _vmem_limit_bytes(T, Bb, H, L, mxu_itemsize):
    f32b = 4
    need = (2 * T * Bb * H * mxu_itemsize            # emb block (double-buffered)
            + 2 * T * Bb * H * f32b                  # enc block (double-buffered)
            + 2 * 2 * L * H * 4 * H * mxu_itemsize   # w_ih + w_hh (double-buffered)
            + 2 * L * 4 * H * f32b                   # bias
            + T * Bb * H * mxu_itemsize              # seq_buf scratch
            + T * Bb * 4 * H * f32b)                 # gpre_buf scratch
    return int(min(128 * 2 ** 20, max(32 * 2 ** 20, 4 * need)))


def lstm_forward(x, params, *, e_layer, pred_leng, batch_block=None,
                 mxu_dtype=None, weight_buffering=2, unroll=8):
    """Pallas implementation of LSTM.forward (eval mode, contrastive_loss == 0).

    batch_block: optional batch tile to shard independent batch blocks over a
      "parallel" grid axis (v7x: 2 TensorCores).  Must equal B or be a multiple
      of 8 dividing B.
    mxu_dtype: dtype for MXU operands (weights + matmul LHS).  Default: bf16
      when H >= 128, else f32.  Accumulation and gate/cell math stay f32.
    weight_buffering: buffer count for the weight/bias BlockSpecs (their
      index_map is constant, so 1 halves weight VMEM on v7x).  Default 2 keeps
      the standard pipelining path.
    """
    B, T, I = x.shape
    H = params["W_e"].shape[0]
    L = e_layer
    f32 = jnp.float32

    if mxu_dtype is None:
        mxu_dtype = jnp.bfloat16 if H >= 128 else f32
    mxu_b = jnp.dtype(mxu_dtype).itemsize

    Bb = B if batch_block is None else batch_block
    assert B % Bb == 0, "batch_block must divide B"
    assert Bb == B or Bb % 8 == 0, "batch_block must equal B or be a multiple of 8"
    n_bb = B // Bb

    x = x.astype(f32)

    # ---- one-time weight prep: pre-transpose, reorder gates to [i,f,o,g] ----
    w_ih = _reorder_gates(
        jnp.transpose(params["W_ih"], (0, 2, 1)).astype(mxu_dtype), H)   # (L,H,4H)
    w_hh = _reorder_gates(
        jnp.transpose(params["W_hh"], (0, 2, 1)).astype(mxu_dtype), H)   # (L,H,4H)
    bz = _reorder_gates((params["b_ih"] + params["b_hh"]).astype(f32), H)
    bz = bz.reshape(L, 1, 4 * H)                                         # (L,1,4H)

    # ---- hoisted embedding, produced directly time-major (no extra transpose) ----
    emb_tm = (jnp.einsum("bti,hi->tbh", x, params["W_e"].astype(f32))
              + params["b_e"].astype(f32)).astype(mxu_dtype)             # (T,B,H)

    kernel = functools.partial(_lstm_kernel, num_layers=L, hidden=H,
                               seq_len=T, batch_blk=Bb, mxu_dtype=mxu_dtype,
                               unroll=min(T, unroll))

    if weight_buffering == 2:
        def w_spec(shape):
            return pl.BlockSpec(shape, lambda b: (0, 0, 0))
    else:
        # Weight index_map is constant — single-buffering halves weight VMEM
        # (mainly useful on v7x's 64 MiB VMEM).
        def w_spec(shape):
            return pl.BlockSpec(shape, lambda b: (0, 0, 0),
                                pipeline_mode=pl.Buffered(weight_buffering))

    cost = pl.CostEstimate(
        flops=int(16 * B * L * T * H * H),
        transcendentals=int(5 * B * L * T * H),
        bytes_accessed=int(T * B * H * (mxu_b + 4)
                           + n_bb * (2 * L * H * 4 * H * mxu_b + L * 4 * H * 4)))

    enc_tm = pl.pallas_call(
        kernel,
        out_shape=jax.ShapeDtypeStruct((T, B, H), f32),
        grid_spec=pltpu.PrefetchScalarGridSpec(
            num_scalar_prefetch=0,
            grid=(n_bb,),                                        # batch blocks
            in_specs=[
                pl.BlockSpec((T, Bb, H), lambda b: (0, b, 0)),   # emb (time-major)
                w_spec((L, H, 4 * H)),                           # W_ih (pre-T, [i,f,o,g])
                w_spec((L, H, 4 * H)),                           # W_hh (pre-T, [i,f,o,g])
                pl.BlockSpec((L, 1, 4 * H), lambda b: (0, 0, 0)),  # fused bias
            ],
            out_specs=pl.BlockSpec((T, Bb, H), lambda b: (0, b, 0)),  # enc (time-major)
            scratch_shapes=[
                pltpu.VMEM((T, Bb, H), mxu_dtype),               # intermediate layer seq
                pltpu.VMEM((T, Bb, 4 * H), f32),                 # hoisted gate pre-acts
            ],
        ),
        compiler_params=pltpu.CompilerParams(
            dimension_semantics=("parallel",),                   # batch blocks independent
            vmem_limit_bytes=_vmem_limit_bytes(T, Bb, H, L, mxu_b)),
        cost_estimate=cost,
    )(emb_tm, w_ih, w_hh, bz)

    # ---- hoisted decoder; batch-major layout folded into the einsum ----
    y = (jnp.einsum("tbh,oh->bto", enc_tm, params["W_d"].astype(f32))
         + params["b_d"].astype(f32))                                    # (B,T,O)
    enc_out = jnp.transpose(enc_tm, (1, 0, 2))                           # (B,T,H)

    # contrastive_loss == 0.0 -> enc_out_aug is None (default eval path)
    return y[:, -pred_leng:, :], enc_out, None


def lstm_reference(x, params, *, e_layer, pred_leng):
    """Pure-JAX reference (mirrors PyTorch eval-mode forward, i,f,g,o gate order)."""
    B, T, I = x.shape
    H = params["W_e"].shape[0]
    L = e_layer
    emb = jnp.einsum("bti,hi->bth", x, params["W_e"]) + params["b_e"]

    def step(carry, x_t):
        hs, cs = carry
        inp = x_t
        new_h, new_c = [], []
        for l in range(L):
            gates = (inp @ params["W_ih"][l].T + hs[l] @ params["W_hh"][l].T
                     + params["b_ih"][l] + params["b_hh"][l])
            i_g = jax.nn.sigmoid(gates[:, 0 * H:1 * H])
            f_g = jax.nn.sigmoid(gates[:, 1 * H:2 * H])
            g_g = jnp.tanh(gates[:, 2 * H:3 * H])
            o_g = jax.nn.sigmoid(gates[:, 3 * H:4 * H])
            c = f_g * cs[l] + i_g * g_g
            h = o_g * jnp.tanh(c)
            new_h.append(h)
            new_c.append(c)
            inp = h
        return (jnp.stack(new_h), jnp.stack(new_c)), inp

    init = (jnp.zeros((L, B, H)), jnp.zeros((L, B, H)))
    _, outs = lax.scan(step, init, jnp.transpose(emb, (1, 0, 2)))
    enc = jnp.transpose(outs, (1, 0, 2))
    y = enc @ params["W_d"].T + params["b_d"]
    return y[:, -pred_leng:, :], enc, None


def make_params(key, input_size, hidden_size, output_size, e_layer):
    ks = jax.random.split(key, 6)
    H, I, O, L = hidden_size, input_size, output_size, e_layer
    return {
        "W_e": 0.01 * jax.random.normal(ks[0], (H, I), jnp.float32),
        "b_e": 0.01 * jax.random.normal(ks[1], (H,), jnp.float32),
        "W_ih": 0.01 * jax.random.normal(ks[2], (L, 4 * H, H), jnp.float32),
        "W_hh": 0.01 * jax.random.normal(ks[3], (L, 4 * H, H), jnp.float32),
        "b_ih": jnp.zeros((L, 4 * H), jnp.float32),
        "b_hh": jnp.zeros((L, 4 * H), jnp.float32),
        "W_d": 0.01 * jax.random.normal(ks[4], (O, H), jnp.float32),
        "b_d": jnp.zeros((O,), jnp.float32),
    }


if __name__ == "__main__":
    # Small config consistent with the module's forward:
    # input_size=4, hidden_size=32, output_size=4, e_layer=2, pred_leng=4, seq=8, batch=2
    B, T, I, H, O, L, PRED = 2, 8, 4, 32, 4, 2, 4

    key = jax.random.PRNGKey(0)
    kx, kp = jax.random.split(key)
    x = jax.random.normal(kx, (B, T, I), jnp.float32)
    params = make_params(kp, I, H, O, L)

    y, enc_out, enc_out_aug = lstm_forward(x, params, e_layer=L, pred_leng=PRED)
    y = jax.block_until_ready(y)
    enc_out = jax.block_until_ready(enc_out)

    y_ref, enc_expected, _ = lstm_reference(x, params, e_layer=L, pred_leng=PRED)
    assert y.shape == (B, PRED, O)
    assert enc_out.shape == (B, T, H)
    assert enc_out_aug is None
    assert jnp.allclose(y, y_ref, atol=2e-3, rtol=2e-3)
    assert jnp.allclose(enc_out, enc_expected, atol=2e-3, rtol=2e-3)

    print("KERNEL_OK")
</pallas_src>

<mosaic_0001>
module attributes {stable_mosaic.version = 11 : i64} {
  func.func @_lstm_kernel(%arg0: i32, %arg1: memref<8x2x32xf32, #tpu.memory_space<vmem>>, %arg2: memref<2x32x128xf32, #tpu.memory_space<vmem>>, %arg3: memref<2x32x128xf32, #tpu.memory_space<vmem>>, %arg4: memref<2x1x128xf32, #tpu.memory_space<vmem>>, %arg5: memref<8x2x32xf32, #tpu.memory_space<vmem>>, %arg6: memref<8x2x32xf32, #tpu.memory_space<vmem>>, %arg7: memref<8x2x128xf32, #tpu.memory_space<vmem>>) attributes {dimension_semantics = [#tpu.dimension_semantics<parallel>], iteration_bounds = array<i64: 1>, scalar_prefetch = 0 : i64, scratch_operands = 2 : i64, tpu.core_type = #tpu.core_type<tc>, window_params = [{transform_indices = @transform_0, window_bounds = array<i64: 8, 2, 32>}, {pipeline_mode = #tpu.pipeline_mode<synchronous>, transform_indices = @transform_1, window_bounds = array<i64: 2, 32, 128>}, {pipeline_mode = #tpu.pipeline_mode<synchronous>, transform_indices = @transform_2, window_bounds = array<i64: 2, 32, 128>}, {pipeline_mode = #tpu.pipeline_mode<synchronous>, transform_indices = @transform_3, window_bounds = array<i64: 2, 1, 128>}, {transform_indices = @transform_4, window_bounds = array<i64: 8, 2, 32>}]} {
    %c0 = arith.constant 0 : index
    %c0_0 = arith.constant 0 : index
    %c0_1 = arith.constant 0 : index
    %0 = vector.load %arg2[%c0, %c0_0, %c0_1] : memref<2x32x128xf32, #tpu.memory_space<vmem>>, vector<1x32x128xf32>
    %1 = vector.shape_cast %0 : vector<1x32x128xf32> to vector<32x128xf32>
    %c0_2 = arith.constant 0 : index
    %c0_3 = arith.constant 0 : index
    %c0_4 = arith.constant 0 : index
    %2 = vector.load %arg3[%c0_2, %c0_3, %c0_4] : memref<2x32x128xf32, #tpu.memory_space<vmem>>, vector<1x32x128xf32>
    %3 = vector.shape_cast %2 : vector<1x32x128xf32> to vector<32x128xf32>
    %c0_5 = arith.constant 0 : index
    %c0_6 = arith.constant 0 : index
    %c0_7 = arith.constant 0 : index
    %4 = vector.load %arg4[%c0_5, %c0_6, %c0_7] : memref<2x1x128xf32, #tpu.memory_space<vmem>>, vector<1x1x128xf32>
    %5 = vector.shape_cast %4 : vector<1x1x128xf32> to vector<1x128xf32>
    %6 = vector.shape_cast %5 : vector<1x128xf32> to vector<1x128xf32>
    %7 = vector.broadcast %6 : vector<1x128xf32> to vector<2x128xf32>
    %c0_i32 = arith.constant 0 : i32
    %8 = arith.index_cast %c0_i32 : i32 to index
    %c0_8 = arith.constant 0 : index
    %c0_9 = arith.constant 0 : index
    %9 = vector.load %arg1[%8, %c0_8, %c0_9] : memref<8x2x32xf32, #tpu.memory_space<vmem>>, vector<1x2x32xf32>
    %10 = vector.shape_cast %9 : vector<1x2x32xf32> to vector<2x32xf32>
    %cst = arith.constant dense<0.000000e+00> : vector<2x128xf32>
    %11 = tpu.matmul %10, %1, %cst {dimension_numbers = #tpu.dot_dimension_numbers<[1], [0], [0], [1], [0, 0, 1, 1], [], []>} : vector<2x32xf32>, vector<32x128xf32>, vector<2x128xf32> -> vector<2x128xf32>
    %12 = arith.addf %11, %7 : vector<2x128xf32>
    %13 = arith.index_cast %c0_i32 : i32 to index
    %c0_10 = arith.constant 0 : index
    %c0_11 = arith.constant 0 : index
    %14 = vector.load %arg7[%13, %c0_10, %c0_11] : memref<8x2x128xf32, #tpu.memory_space<vmem>>, vector<1x2x128xf32>
    %15 = vector.shape_cast %14 : vector<1x2x128xf32> to vector<2x128xf32>
    %16 = vector.shape_cast %12 : vector<2x128xf32> to vector<1x2x128xf32>
    tpu.vector_store %arg7[%13, %c0_10, %c0_11], %16 {strides = array<i32>} : memref<8x2x128xf32, #tpu.memory_space<vmem>>, vector<1x2x128xf32>,
    %c1_i32 = arith.constant 1 : i32
    %17 = arith.index_cast %c1_i32 : i32 to index
    %c0_12 = arith.constant 0 : index
    %c0_13 = arith.constant 0 : index
    %18 = vector.load %arg1[%17, %c0_12, %c0_13] : memref<8x2x32xf32, #tpu.memory_space<vmem>>, vector<1x2x32xf32>
    %19 = vector.shape_cast %18 : vector<1x2x32xf32> to vector<2x32xf32>
    %cst_14 = arith.constant dense<0.000000e+00> : vector<2x128xf32>
    %20 = tpu.matmul %19, %1, %cst_14 {dimension_numbers = #tpu.dot_dimension_numbers<[1], [0], [0], [1], [0, 0, 1, 1], [], []>} : vector<2x32xf32>, vector<32x128xf32>, vector<2x128xf32> -> vector<2x128xf32>
    %21 = arith.addf %20, %7 : vector<2x128xf32>
    %22 = arith.index_cast %c1_i32 : i32 to index
    %c0_15 = arith.constant 0 : index
    %c0_16 = arith.constant 0 : index
    %23 = vector.load %arg7[%22, %c0_15, %c0_16] : memref<8x2x128xf32, #tpu.memory_space<vmem>>, vector<1x2x128xf32>
    %24 = vector.shape_cast %23 : vector<1x2x128xf32> to vector<2x128xf32>
    %25 = vector.shape_cast %21 : vector<2x128xf32> to vector<1x2x128xf32>
    tpu.vector_store %arg7[%22, %c0_15, %c0_16], %25 {strides = array<i32>} : memref<8x2x128xf32, #tpu.memory_space<vmem>>, vector<1x2x128xf32>,
    %c2_i32 = arith.constant 2 : i32
    %26 = arith.index_cast %c2_i32 : i32 to index
    %c0_17 = arith.constant 0 : index
    %c0_18 = arith.constant 0 : index
    %27 = vector.load %arg1[%26, %c0_17, %c0_18] : memref<8x2x32xf32, #tpu.memory_space<vmem>>, vector<1x2x32xf32>
    %28 = vector.shape_cast %27 : vector<1x2x32xf32> to vector<2x32xf32>
    %cst_19 = arith.constant dense<0.000000e+00> : vector<2x128xf32>
    %29 = tpu.matmul %28, %1, %cst_19 {dimension_numbers = #tpu.dot_dimension_numbers<[1], [0], [0], [1], [0, 0, 1, 1], [], []>} : vector<2x32xf32>, vector<32x128xf32>, vector<2x128xf32> -> vector<2x128xf32>
    %30 = arith.addf %29, %7 : vector<2x128xf32>
    %31 = arith.index_cast %c2_i32 : i32 to index
    %c0_20 = arith.constant 0 : index
    %c0_21 = arith.constant 0 : index
    %32 = vector.load %arg7[%31, %c0_20, %c0_21] : memref<8x2x128xf32, #tpu.memory_space<vmem>>, vector<1x2x128xf32>
    %33 = vector.shape_cast %32 : vector<1x2x128xf32> to vector<2x128xf32>
    %34 = vector.shape_cast %30 : vector<2x128xf32> to vector<1x2x128xf32>
    tpu.vector_store %arg7[%31, %c0_20, %c0_21], %34 {strides = array<i32>} : memref<8x2x128xf32, #tpu.memory_space<vmem>>, vector<1x2x128xf32>,
    %c3_i32 = arith.constant 3 : i32
    %35 = arith.index_cast %c3_i32 : i32 to index
    %c0_22 = arith.constant 0 : index
    %c0_23 = arith.constant 0 : index
    %36 = vector.load %arg1[%35, %c0_22, %c0_23] : memref<8x2x32xf32, #tpu.memory_space<vmem>>, vector<1x2x32xf32>
    %37 = vector.shape_cast %36 : vector<1x2x32xf32> to vector<2x32xf32>
    %cst_24 = arith.constant dense<0.000000e+00> : vector<2x128xf32>
    %38 = tpu.matmul %37, %1, %cst_24 {dimension_numbers = #tpu.dot_dimension_numbers<[1], [0], [0], [1], [0, 0, 1, 1], [], []>} : vector<2x32xf32>, vector<32x128xf32>, vector<2x128xf32> -> vector<2x128xf32>
    %39 = arith.addf %38, %7 : vector<2x128xf32>
    %40 = arith.index_cast %c3_i32 : i32 to index
    %c0_25 = arith.constant 0 : index
    %c0_26 = arith.constant 0 : index
    %41 = vector.load %arg7[%40, %c0_25, %c0_26] : memref<8x2x128xf32, #tpu.memory_space<vmem>>, vector<1x2x128xf32>
    %42 = vector.shape_cast %41 : vector<1x2x128xf32> to vector<2x128xf32>
    %43 = vector.shape_cast %39 : vector<2x128xf32> to vector<1x2x128xf32>
    tpu.vector_store %arg7[%40, %c0_25, %c0_26], %43 {strides = array<i32>} : memref<8x2x128xf32, #tpu.memory_space<vmem>>, vector<1x2x128xf32>,
    %c4_i32 = arith.constant 4 : i32
    %44 = arith.index_cast %c4_i32 : i32 to index
    %c0_27 = arith.constant 0 : index
    %c0_28 = arith.constant 0 : index
    %45 = vector.load %arg1[%44, %c0_27, %c0_28] : memref<8x2x32xf32, #tpu.memory_space<vmem>>, vector<1x2x32xf32>
    %46 = vector.shape_cast %45 : vector<1x2x32xf32> to vector<2x32xf32>
    %cst_29 = arith.constant dense<0.000000e+00> : vector<2x128xf32>
    %47 = tpu.matmul %46, %1, %cst_29 {dimension_numbers = #tpu.dot_dimension_numbers<[1], [0], [0], [1], [0, 0, 1, 1], [], []>} : vector<2x32xf32>, vector<32x128xf32>, vector<2x128xf32> -> vector<2x128xf32>
    %48 = arith.addf %47, %7 : vector<2x128xf32>
    %49 = arith.index_cast %c4_i32 : i32 to index
    %c0_30 = arith.constant 0 : index
    %c0_31 = arith.constant 0 : index
    %50 = vector.load %arg7[%49, %c0_30, %c0_31] : memref<8x2x128xf32, #tpu.memory_space<vmem>>, vector<1x2x128xf32>
    %51 = vector.shape_cast %50 : vector<1x2x128xf32> to vector<2x128xf32>
    %52 = vector.shape_cast %48 : vector<2x128xf32> to vector<1x2x128xf32>
    tpu.vector_store %arg7[%49, %c0_30, %c0_31], %52 {strides = array<i32>} : memref<8x2x128xf32, #tpu.memory_space<vmem>>, vector<1x2x128xf32>,
    %c5_i32 = arith.constant 5 : i32
    %53 = arith.index_cast %c5_i32 : i32 to index
    %c0_32 = arith.constant 0 : index
    %c0_33 = arith.constant 0 : index
    %54 = vector.load %arg1[%53, %c0_32, %c0_33] : memref<8x2x32xf32, #tpu.memory_space<vmem>>, vector<1x2x32xf32>
    %55 = vector.shape_cast %54 : vector<1x2x32xf32> to vector<2x32xf32>
    %cst_34 = arith.constant dense<0.000000e+00> : vector<2x128xf32>
    %56 = tpu.matmul %55, %1, %cst_34 {dimension_numbers = #tpu.dot_dimension_numbers<[1], [0], [0], [1], [0, 0, 1, 1], [], []>} : vector<2x32xf32>, vector<32x128xf32>, vector<2x128xf32> -> vector<2x128xf32>
    %57 = arith.addf %56, %7 : vector<2x128xf32>
    %58 = arith.index_cast %c5_i32 : i32 to index
    %c0_35 = arith.constant 0 : index
    %c0_36 = arith.constant 0 : index
    %59 = vector.load %arg7[%58, %c0_35, %c0_36] : memref<8x2x128xf32, #tpu.memory_space<vmem>>, vector<1x2x128xf32>
    %60 = vector.shape_cast %59 : vector<1x2x128xf32> to vector<2x128xf32>
    %61 = vector.shape_cast %57 : vector<2x128xf32> to vector<1x2x128xf32>
    tpu.vector_store %arg7[%58, %c0_35, %c0_36], %61 {strides = array<i32>} : memref<8x2x128xf32, #tpu.memory_space<vmem>>, vector<1x2x128xf32>,
    %c6_i32 = arith.constant 6 : i32
    %62 = arith.index_cast %c6_i32 : i32 to index
    %c0_37 = arith.constant 0 : index
    %c0_38 = arith.constant 0 : index
    %63 = vector.load %arg1[%62, %c0_37, %c0_38] : memref<8x2x32xf32, #tpu.memory_space<vmem>>, vector<1x2x32xf32>
    %64 = vector.shape_cast %63 : vector<1x2x32xf32> to vector<2x32xf32>
    %cst_39 = arith.constant dense<0.000000e+00> : vector<2x128xf32>
    %65 = tpu.matmul %64, %1, %cst_39 {dimension_numbers = #tpu.dot_dimension_numbers<[1], [0], [0], [1], [0, 0, 1, 1], [], []>} : vector<2x32xf32>, vector<32x128xf32>, vector<2x128xf32> -> vector<2x128xf32>
    %66 = arith.addf %65, %7 : vector<2x128xf32>
    %67 = arith.index_cast %c6_i32 : i32 to index
    %c0_40 = arith.constant 0 : index
    %c0_41 = arith.constant 0 : index
    %68 = vector.load %arg7[%67, %c0_40, %c0_41] : memref<8x2x128xf32, #tpu.memory_space<vmem>>, vector<1x2x128xf32>
    %69 = vector.shape_cast %68 : vector<1x2x128xf32> to vector<2x128xf32>
    %70 = vector.shape_cast %66 : vector<2x128xf32> to vector<1x2x128xf32>
    tpu.vector_store %arg7[%67, %c0_40, %c0_41], %70 {strides = array<i32>} : memref<8x2x128xf32, #tpu.memory_space<vmem>>, vector<1x2x128xf32>,
    %c7_i32 = arith.constant 7 : i32
    %71 = arith.index_cast %c7_i32 : i32 to index
    %c0_42 = arith.constant 0 : index
    %c0_43 = arith.constant 0 : index
    %72 = vector.load %arg1[%71, %c0_42, %c0_43] : memref<8x2x32xf32, #tpu.memory_space<vmem>>, vector<1x2x32xf32>
    %73 = vector.shape_cast %72 : vector<1x2x32xf32> to vector<2x32xf32>
    %cst_44 = arith.constant dense<0.000000e+00> : vector<2x128xf32>
    %74 = tpu.matmul %73, %1, %cst_44 {dimension_numbers = #tpu.dot_dimension_numbers<[1], [0], [0], [1], [0, 0, 1, 1], [], []>} : vector<2x32xf32>, vector<32x128xf32>, vector<2x128xf32> -> vector<2x128xf32>
    %75 = arith.addf %74, %7 : vector<2x128xf32>
    %76 = arith.index_cast %c7_i32 : i32 to index
    %c0_45 = arith.constant 0 : index
    %c0_46 = arith.constant 0 : index
    %77 = vector.load %arg7[%76, %c0_45, %c0_46] : memref<8x2x128xf32, #tpu.memory_space<vmem>>, vector<1x2x128xf32>
    %78 = vector.shape_cast %77 : vector<1x2x128xf32> to vector<2x128xf32>
    %79 = vector.shape_cast %75 : vector<2x128xf32> to vector<1x2x128xf32>
    tpu.vector_store %arg7[%76, %c0_45, %c0_46], %79 {strides = array<i32>} : memref<8x2x128xf32, #tpu.memory_space<vmem>>, vector<1x2x128xf32>,
    %c8_i32 = arith.constant 8 : i32
    %cst_47 = arith.constant 0.000000e+00 : f32
    %80 = vector.broadcast %cst_47 : f32 to vector<2x32xf32>
    %c0_i32_48 = arith.constant 0 : i32
    %81 = arith.index_cast %c0_i32_48 : i32 to index
    %c0_49 = arith.constant 0 : index
    %c0_50 = arith.constant 0 : index
    %82 = vector.load %arg7[%81, %c0_49, %c0_50] : memref<8x2x128xf32, #tpu.memory_space<vmem>>, vector<1x2x128xf32>
    %83 = vector.shape_cast %82 : vector<1x2x128xf32> to vector<2x128xf32>
    %cst_51 = arith.constant dense<0.000000e+00> : vector<2x128xf32>
    %84 = tpu.matmul %80, %3, %cst_51 {dimension_numbers = #tpu.dot_dimension_numbers<[1], [0], [0], [1], [0, 0, 1, 1], [], []>} : vector<2x32xf32>, vector<32x128xf32>, vector<2x128xf32> -> vector<2x128xf32>
    %85 = arith.addf %83, %84 : vector<2x128xf32>
    %86 = vector.extract_strided_slice %85 {offsets = [0, 0], sizes = [2, 96], strides = [1, 1]} : vector<2x128xf32> to vector<2x96xf32>
    %87 = arith.negf %86 : vector<2x96xf32>
    %88 = math.exp %87 : vector<2x96xf32>
    %cst_52 = arith.constant 1.000000e+00 : f32
    %89 = vector.broadcast %cst_52 : f32 to vector<2x96xf32>
    %90 = arith.addf %89, %88 : vector<2x96xf32>
    %91 = arith.divf %89, %90 : vector<2x96xf32>
    %92 = vector.extract_strided_slice %85 {offsets = [0, 96], sizes = [2, 32], strides = [1, 1]} : vector<2x128xf32> to vector<2x32xf32>
    %93 = math.tanh %92 : vector<2x32xf32>
    %94 = vector.extract_strided_slice %91 {offsets = [0, 0], sizes = [2, 32], strides = [1, 1]} : vector<2x96xf32> to vector<2x32xf32>
    %95 = vector.extract_strided_slice %91 {offsets = [0, 32], sizes = [2, 32], strides = [1, 1]} : vector<2x96xf32> to vector<2x32xf32>
    %96 = vector.extract_strided_slice %91 {offsets = [0, 64], sizes = [2, 32], strides = [1, 1]} : vector<2x96xf32> to vector<2x32xf32>
    %97 = arith.mulf %95, %80 : vector<2x32xf32>
    %98 = arith.mulf %94, %93 : vector<2x32xf32>
    %99 = arith.addf %97, %98 : vector<2x32xf32>
    %100 = math.tanh %99 : vector<2x32xf32>
    %101 = arith.mulf %96, %100 : vector<2x32xf32>
    %102 = arith.index_cast %c0_i32_48 : i32 to index
    %c0_53 = arith.constant 0 : index
    %c0_54 = arith.constant 0 : index
    %103 = vector.load %arg6[%102, %c0_53, %c0_54] : memref<8x2x32xf32, #tpu.memory_space<vmem>>, vector<1x2x32xf32>
    %104 = vector.shape_cast %103 : vector<1x2x32xf32> to vector<2x32xf32>
    %105 = vector.shape_cast %101 : vector<2x32xf32> to vector<1x2x32xf32>
    tpu.vector_store %arg6[%102, %c0_53, %c0_54], %105 {strides = array<i32>} : memref<8x2x32xf32, #tpu.memory_space<vmem>>, vector<1x2x32xf32>,
    %c1_i32_55 = arith.constant 1 : i32
    %106 = arith.index_cast %c1_i32_55 : i32 to index
    %c0_56 = arith.constant 0 : index
    %c0_57 = arith.constant 0 : index
    %107 = vector.load %arg7[%106, %c0_56, %c0_57] : memref<8x2x128xf32, #tpu.memory_space<vmem>>, vector<1x2x128xf32>
    %108 = vector.shape_cast %107 : vector<1x2x128xf32> to vector<2x128xf32>
    %cst_58 = arith.constant dense<0.000000e+00> : vector<2x128xf32>
    %109 = tpu.matmul %101, %3, %cst_58 {dimension_numbers = #tpu.dot_dimension_numbers<[1], [0], [0], [1], [0, 0, 1, 1], [], []>} : vector<2x32xf32>, vector<32x128xf32>, vector<2x128xf32> -> vector<2x128xf32>
    %110 = arith.addf %108, %109 : vector<2x128xf32>
    %111 = vector.extract_strided_slice %110 {offsets = [0, 0], sizes = [2, 96], strides = [1, 1]} : vector<2x128xf32> to vector<2x96xf32>
    %112 = arith.negf %111 : vector<2x96xf32>
    %113 = math.exp %112 : vector<2x96xf32>
    %cst_59 = arith.constant 1.000000e+00 : f32
    %114 = vector.broadcast %cst_59 : f32 to vector<2x96xf32>
    %115 = arith.addf %114, %113 : vector<2x96xf32>
    %116 = arith.divf %114, %115 : vector<2x96xf32>
    %117 = vector.extract_strided_slice %110 {offsets = [0, 96], sizes = [2, 32], strides = [1, 1]} : vector<2x128xf32> to vector<2x32xf32>
    %118 = math.tanh %117 : vector<2x32xf32>
    %119 = vector.extract_strided_slice %116 {offsets = [0, 0], sizes = [2, 32], strides = [1, 1]} : vector<2x96xf32> to vector<2x32xf32>
    %120 = vector.extract_strided_slice %116 {offsets = [0, 32], sizes = [2, 32], strides = [1, 1]} : vector<2x96xf32> to vector<2x32xf32>
    %121 = vector.extract_strided_slice %116 {offsets = [0, 64], sizes = [2, 32], strides = [1, 1]} : vector<2x96xf32> to vector<2x32xf32>
    %122 = arith.mulf %120, %99 : vector<2x32xf32>
    %123 = arith.mulf %119, %118 : vector<2x32xf32>
    %124 = arith.addf %122, %123 : vector<2x32xf32>
    %125 = math.tanh %124 : vector<2x32xf32>
    %126 = arith.mulf %121, %125 : vector<2x32xf32>
    %127 = arith.index_cast %c1_i32_55 : i32 to index
    %c0_60 = arith.constant 0 : index
    %c0_61 = arith.constant 0 : index
    %128 = vector.load %arg6[%127, %c0_60, %c0_61] : memref<8x2x32xf32, #tpu.memory_space<vmem>>, vector<1x2x32xf32>
    %129 = vector.shape_cast %128 : vector<1x2x32xf32> to vector<2x32xf32>
    %130 = vector.shape_cast %126 : vector<2x32xf32> to vector<1x2x32xf32>
    tpu.vector_store %arg6[%127, %c0_60, %c0_61], %130 {strides = array<i32>} : memref<8x2x32xf32, #tpu.memory_space<vmem>>, vector<1x2x32xf32>,
    %c2_i32_62 = arith.constant 2 : i32
    %131 = arith.index_cast %c2_i32_62 : i32 to index
    %c0_63 = arith.constant 0 : index
    %c0_64 = arith.constant 0 : index
    %132 = vector.load %arg7[%131, %c0_63, %c0_64] : memref<8x2x128xf32, #tpu.memory_space<vmem>>, vector<1x2x128xf32>
    %133 = vector.shape_cast %132 : vector<1x2x128xf32> to vector<2x128xf32>
    %cst_65 = arith.constant dense<0.000000e+00> : vector<2x128xf32>
    %134 = tpu.matmul %126, %3, %cst_65 {dimension_numbers = #tpu.dot_dimension_numbers<[1], [0], [0], [1], [0, 0, 1, 1], [], []>} : vector<2x32xf32>, vector<32x128xf32>, vector<2x128xf32> -> vector<2x128xf32>
    %135 = arith.addf %133, %134 : vector<2x128xf32>
    %136 = vector.extract_strided_slice %135 {offsets = [0, 0], sizes = [2, 96], strides = [1, 1]} : vector<2x128xf32> to vector<2x96xf32>
    %137 = arith.negf %136 : vector<2x96xf32>
    %138 = math.exp %137 : vector<2x96xf32>
    %cst_66 = arith.constant 1.000000e+00 : f32
    %139 = vector.broadcast %cst_66 : f32 to vector<2x96xf32>
    %140 = arith.addf %139, %138 : vector<2x96xf32>
    %141 = arith.divf %139, %140 : vector<2x96xf32>
    %142 = vector.extract_strided_slice %135 {offsets = [0, 96], sizes = [2, 32], strides = [1, 1]} : vector<2x128xf32> to vector<2x32xf32>
    %143 = math.tanh %142 : vector<2x32xf32>
    %144 = vector.extract_strided_slice %141 {offsets = [0, 0], sizes = [2, 32], strides = [1, 1]} : vector<2x96xf32> to vector<2x32xf32>
    %145 = vector.extract_strided_slice %141 {offsets = [0, 32], sizes = [2, 32], strides = [1, 1]} : vector<2x96xf32> to vector<2x32xf32>
    %146 = vector.extract_strided_slice %141 {offsets = [0, 64], sizes = [2, 32], strides = [1, 1]} : vector<2x96xf32> to vector<2x32xf32>
    %147 = arith.mulf %145, %124 : vector<2x32xf32>
    %148 = arith.mulf %144, %143 : vector<2x32xf32>
    %149 = arith.addf %147, %148 : vector<2x32xf32>
    %150 = math.tanh %149 : vector<2x32xf32>
    %151 = arith.mulf %146, %150 : vector<2x32xf32>
    %152 = arith.index_cast %c2_i32_62 : i32 to index
    %c0_67 = arith.constant 0 : index
    %c0_68 = arith.constant 0 : index
    %153 = vector.load %arg6[%152, %c0_67, %c0_68] : memref<8x2x32xf32, #tpu.memory_space<vmem>>, vector<1x2x32xf32>
    %154 = vector.shape_cast %153 : vector<1x2x32xf32> to vector<2x32xf32>
    %155 = vector.shape_cast %151 : vector<2x32xf32> to vector<1x2x32xf32>
    tpu.vector_store %arg6[%152, %c0_67, %c0_68], %155 {strides = array<i32>} : memref<8x2x32xf32, #tpu.memory_space<vmem>>, vector<1x2x32xf32>,
    %c3_i32_69 = arith.constant 3 : i32
    %156 = arith.index_cast %c3_i32_69 : i32 to index
    %c0_70 = arith.constant 0 : index
    %c0_71 = arith.constant 0 : index
    %157 = vector.load %arg7[%156, %c0_70, %c0_71] : memref<8x2x128xf32, #tpu.memory_space<vmem>>, vector<1x2x128xf32>
    %158 = vector.shape_cast %157 : vector<1x2x128xf32> to vector<2x128xf32>
    %cst_72 = arith.constant dense<0.000000e+00> : vector<2x128xf32>
    %159 = tpu.matmul %151, %3, %cst_72 {dimension_numbers = #tpu.dot_dimension_numbers<[1], [0], [0], [1], [0, 0, 1, 1], [], []>} : vector<2x32xf32>, vector<32x128xf32>, vector<2x128xf32> -> vector<2x128xf32>
    %160 = arith.addf %158, %159 : vector<2x128xf32>
    %161 = vector.extract_strided_slice %160 {offsets = [0, 0], sizes = [2, 96], strides = [1, 1]} : vector<2x128xf32> to vector<2x96xf32>
    %162 = arith.negf %161 : vector<2x96xf32>
    %163 = math.exp %162 : vector<2x96xf32>
    %cst_73 = arith.constant 1.000000e+00 : f32
    %164 = vector.broadcast %cst_73 : f32 to vector<2x96xf32>
    %165 = arith.addf %164, %163 : vector<2x96xf32>
    %166 = arith.divf %164, %165 : vector<2x96xf32>
    %167 = vector.extract_strided_slice %160 {offsets = [0, 96], sizes = [2, 32], strides = [1, 1]} : vector<2x128xf32> to vector<2x32xf32>
    %168 = math.tanh %167 : vector<2x32xf32>
    %169 = vector.extract_strided_slice %166 {offsets = [0, 0], sizes = [2, 32], strides = [1, 1]} : vector<2x96xf32> to vector<2x32xf32>
    %170 = vector.extract_strided_slice %166 {offsets = [0, 32], sizes = [2, 32], strides = [1, 1]} : vector<2x96xf32> to vector<2x32xf32>
    %171 = vector.extract_strided_slice %166 {offsets = [0, 64], sizes = [2, 32], strides = [1, 1]} : vector<2x96xf32> to vector<2x32xf32>
    %172 = arith.mulf %170, %149 : vector<2x32xf32>
    %173 = arith.mulf %169, %168 : vector<2x32xf32>
    %174 = arith.addf %172, %173 : vector<2x32xf32>
    %175 = math.tanh %174 : vector<2x32xf32>
    %176 = arith.mulf %171, %175 : vector<2x32xf32>
    %177 = arith.index_cast %c3_i32_69 : i32 to index
    %c0_74 = arith.constant 0 : index
    %c0_75 = arith.constant 0 : index
    %178 = vector.load %arg6[%177, %c0_74, %c0_75] : memref<8x2x32xf32, #tpu.memory_space<vmem>>, vector<1x2x32xf32>
    %179 = vector.shape_cast %178 : vector<1x2x32xf32> to vector<2x32xf32>
    %180 = vector.shape_cast %176 : vector<2x32xf32> to vector<1x2x32xf32>
    tpu.vector_store %arg6[%177, %c0_74, %c0_75], %180 {strides = array<i32>} : memref<8x2x32xf32, #tpu.memory_space<vmem>>, vector<1x2x32xf32>,
    %c4_i32_76 = arith.constant 4 : i32
    %181 = arith.index_cast %c4_i32_76 : i32 to index
    %c0_77 = arith.constant 0 : index
    %c0_78 = arith.constant 0 : index
    %182 = vector.load %arg7[%181, %c0_77, %c0_78] : memref<8x2x128xf32, #tpu.memory_space<vmem>>, vector<1x2x128xf32>
    %183 = vector.shape_cast %182 : vector<1x2x128xf32> to vector<2x128xf32>
    %cst_79 = arith.constant dense<0.000000e+00> : vector<2x128xf32>
    %184 = tpu.matmul %176, %3, %cst_79 {dimension_numbers = #tpu.dot_dimension_numbers<[1], [0], [0], [1], [0, 0, 1, 1], [], []>} : vector<2x32xf32>, vector<32x128xf32>, vector<2x128xf32> -> vector<2x128xf32>
    %185 = arith.addf %183, %184 : vector<2x128xf32>
    %186 = vector.extract_strided_slice %185 {offsets = [0, 0], sizes = [2, 96], strides = [1, 1]} : vector<2x128xf32> to vector<2x96xf32>
    %187 = arith.negf %186 : vector<2x96xf32>
    %188 = math.exp %187 : vector<2x96xf32>
    %cst_80 = arith.constant 1.000000e+00 : f32
    %189 = vector.broadcast %cst_80 : f32 to vector<2x96xf32>
    %190 = arith.addf %189, %188 : vector<2x96xf32>
    %191 = arith.divf %189, %190 : vector<2x96xf32>
    %192 = vector.extract_strided_slice %185 {offsets = [0, 96], sizes = [2, 32], strides = [1, 1]} : vector<2x128xf32> to vector<2x32xf32>
    %193 = math.tanh %192 : vector<2x32xf32>
    %194 = vector.extract_strided_slice %191 {offsets = [0, 0], sizes = [2, 32], strides = [1, 1]} : vector<2x96xf32> to vector<2x32xf32>
    %195 = vector.extract_strided_slice %191 {offsets = [0, 32], sizes = [2, 32], strides = [1, 1]} : vector<2x96xf32> to vector<2x32xf32>
    %196 = vector.extract_strided_slice %191 {offsets = [0, 64], sizes = [2, 32], strides = [1, 1]} : vector<2x96xf32> to vector<2x32xf32>
    %197 = arith.mulf %195, %174 : vector<2x32xf32>
    %198 = arith.mulf %194, %193 : vector<2x32xf32>
    %199 = arith.addf %197, %198 : vector<2x32xf32>
    %200 = math.tanh %199 : vector<2x32xf32>
    %201 = arith.mulf %196, %200 : vector<2x32xf32>
    %202 = arith.index_cast %c4_i32_76 : i32 to index
    %c0_81 = arith.constant 0 : index
    %c0_82 = arith.constant 0 : index
    %203 = vector.load %arg6[%202, %c0_81, %c0_82] : memref<8x2x32xf32, #tpu.memory_space<vmem>>, vector<1x2x32xf32>
    %204 = vector.shape_cast %203 : vector<1x2x32xf32> to vector<2x32xf32>
    %205 = vector.shape_cast %201 : vector<2x32xf32> to vector<1x2x32xf32>
    tpu.vector_store %arg6[%202, %c0_81, %c0_82], %205 {strides = array<i32>} : memref<8x2x32xf32, #tpu.memory_space<vmem>>, vector<1x2x32xf32>,
    %c5_i32_83 = arith.constant 5 : i32
    %206 = arith.index_cast %c5_i32_83 : i32 to index
    %c0_84 = arith.constant 0 : index
    %c0_85 = arith.constant 0 : index
    %207 = vector.load %arg7[%206, %c0_84, %c0_85] : memref<8x2x128xf32, #tpu.memory_space<vmem>>, vector<1x2x128xf32>
    %208 = vector.shape_cast %207 : vector<1x2x128xf32> to vector<2x128xf32>
    %cst_86 = arith.constant dense<0.000000e+00> : vector<2x128xf32>
    %209 = tpu.matmul %201, %3, %cst_86 {dimension_numbers = #tpu.dot_dimension_numbers<[1], [0], [0], [1], [0, 0, 1, 1], [], []>} : vector<2x32xf32>, vector<32x128xf32>, vector<2x128xf32> -> vector<2x128xf32>
    %210 = arith.addf %208, %209 : vector<2x128xf32>
    %211 = vector.extract_strided_slice %210 {offsets = [0, 0], sizes = [2, 96], strides = [1, 1]} : vector<2x128xf32> to vector<2x96xf32>
    %212 = arith.negf %211 : vector<2x96xf32>
    %213 = math.exp %212 : vector<2x96xf32>
    %cst_87 = arith.constant 1.000000e+00 : f32
    %214 = vector.broadcast %cst_87 : f32 to vector<2x96xf32>
    %215 = arith.addf %214, %213 : vector<2x96xf32>
    %216 = arith.divf %214, %215 : vector<2x96xf32>
    %217 = vector.extract_strided_slice %210 {offsets = [0, 96], sizes = [2, 32], strides = [1, 1]} : vector<2x128xf32> to vector<2x32xf32>
    %218 = math.tanh %217 : vector<2x32xf32>
    %219 = vector.extract_strided_slice %216 {offsets = [0, 0], sizes = [2, 32], strides = [1, 1]} : vector<2x96xf32> to vector<2x32xf32>
    %220 = vector.extract_strided_slice %216 {offsets = [0, 32], sizes = [2, 32], strides = [1, 1]} : vector<2x96xf32> to vector<2x32xf32>
    %221 = vector.extract_strided_slice %216 {offsets = [0, 64], sizes = [2, 32], strides = [1, 1]} : vector<2x96xf32> to vector<2x32xf32>
    %222 = arith.mulf %220, %199 : vector<2x32xf32>
    %223 = arith.mulf %219, %218 : vector<2x32xf32>
    %224 = arith.addf %222, %223 : vector<2x32xf32>
    %225 = math.tanh %224 : vector<2x32xf32>
    %226 = arith.mulf %221, %225 : vector<2x32xf32>
    %227 = arith.index_cast %c5_i32_83 : i32 to index
    %c0_88 = arith.constant 0 : index
    %c0_89 = arith.constant 0 : index
    %228 = vector.load %arg6[%227, %c0_88, %c0_89] : memref<8x2x32xf32, #tpu.memory_space<vmem>>, vector<1x2x32xf32>
    %229 = vector.shape_cast %228 : vector<1x2x32xf32> to vector<2x32xf32>
    %230 = vector.shape_cast %226 : vector<2x32xf32> to vector<1x2x32xf32>
    tpu.vector_store %arg6[%227, %c0_88, %c0_89], %230 {strides = array<i32>} : memref<8x2x32xf32, #tpu.memory_space<vmem>>, vector<1x2x32xf32>,
    %c6_i32_90 = arith.constant 6 : i32
    %231 = arith.index_cast %c6_i32_90 : i32 to index
    %c0_91 = arith.constant 0 : index
    %c0_92 = arith.constant 0 : index
    %232 = vector.load %arg7[%231, %c0_91, %c0_92] : memref<8x2x128xf32, #tpu.memory_space<vmem>>, vector<1x2x128xf32>
    %233 = vector.shape_cast %232 : vector<1x2x128xf32> to vector<2x128xf32>
    %cst_93 = arith.constant dense<0.000000e+00> : vector<2x128xf32>
    %234 = tpu.matmul %226, %3, %cst_93 {dimension_numbers = #tpu.dot_dimension_numbers<[1], [0], [0], [1], [0, 0, 1, 1], [], []>} : vector<2x32xf32>, vector<32x128xf32>, vector<2x128xf32> -> vector<2x128xf32>
    %235 = arith.addf %233, %234 : vector<2x128xf32>
    %236 = vector.extract_strided_slice %235 {offsets = [0, 0], sizes = [2, 96], strides = [1, 1]} : vector<2x128xf32> to vector<2x96xf32>
    %237 = arith.negf %236 : vector<2x96xf32>
    %238 = math.exp %237 : vector<2x96xf32>
    %cst_94 = arith.constant 1.000000e+00 : f32
    %239 = vector.broadcast %cst_94 : f32 to vector<2x96xf32>
    %240 = arith.addf %239, %238 : vector<2x96xf32>
    %241 = arith.divf %239, %240 : vector<2x96xf32>
    %242 = vector.extract_strided_slice %235 {offsets = [0, 96], sizes = [2, 32], strides = [1, 1]} : vector<2x128xf32> to vector<2x32xf32>
    %243 = math.tanh %242 : vector<2x32xf32>
    %244 = vector.extract_strided_slice %241 {offsets = [0, 0], sizes = [2, 32], strides = [1, 1]} : vector<2x96xf32> to vector<2x32xf32>
    %245 = vector.extract_strided_slice %241 {offsets = [0, 32], sizes = [2, 32], strides = [1, 1]} : vector<2x96xf32> to vector<2x32xf32>
    %246 = vector.extract_strided_slice %241 {offsets = [0, 64], sizes = [2, 32], strides = [1, 1]} : vector<2x96xf32> to vector<2x32xf32>
    %247 = arith.mulf %245, %224 : vector<2x32xf32>
    %248 = arith.mulf %244, %243 : vector<2x32xf32>
    %249 = arith.addf %247, %248 : vector<2x32xf32>
    %250 = math.tanh %249 : vector<2x32xf32>
    %251 = arith.mulf %246, %250 : vector<2x32xf32>
    %252 = arith.index_cast %c6_i32_90 : i32 to index
    %c0_95 = arith.constant 0 : index
    %c0_96 = arith.constant 0 : index
    %253 = vector.load %arg6[%252, %c0_95, %c0_96] : memref<8x2x32xf32, #tpu.memory_space<vmem>>, vector<1x2x32xf32>
    %254 = vector.shape_cast %253 : vector<1x2x32xf32> to vector<2x32xf32>
    %255 = vector.shape_cast %251 : vector<2x32xf32> to vector<1x2x32xf32>
    tpu.vector_store %arg6[%252, %c0_95, %c0_96], %255 {strides = array<i32>} : memref<8x2x32xf32, #tpu.memory_space<vmem>>, vector<1x2x32xf32>,
    %c7_i32_97 = arith.constant 7 : i32
    %256 = arith.index_cast %c7_i32_97 : i32 to index
    %c0_98 = arith.constant 0 : index
    %c0_99 = arith.constant 0 : index
    %257 = vector.load %arg7[%256, %c0_98, %c0_99] : memref<8x2x128xf32, #tpu.memory_space<vmem>>, vector<1x2x128xf32>
    %258 = vector.shape_cast %257 : vector<1x2x128xf32> to vector<2x128xf32>
    %cst_100 = arith.constant dense<0.000000e+00> : vector<2x128xf32>
    %259 = tpu.matmul %251, %3, %cst_100 {dimension_numbers = #tpu.dot_dimension_numbers<[1], [0], [0], [1], [0, 0, 1, 1], [], []>} : vector<2x32xf32>, vector<32x128xf32>, vector<2x128xf32> -> vector<2x128xf32>
    %260 = arith.addf %258, %259 : vector<2x128xf32>
    %261 = vector.extract_strided_slice %260 {offsets = [0, 0], sizes = [2, 96], strides = [1, 1]} : vector<2x128xf32> to vector<2x96xf32>
    %262 = arith.negf %261 : vector<2x96xf32>
    %263 = math.exp %262 : vector<2x96xf32>
    %cst_101 = arith.constant 1.000000e+00 : f32
    %264 = vector.broadcast %cst_101 : f32 to vector<2x96xf32>
    %265 = arith.addf %264, %263 : vector<2x96xf32>
    %266 = arith.divf %264, %265 : vector<2x96xf32>
    %267 = vector.extract_strided_slice %260 {offsets = [0, 96], sizes = [2, 32], strides = [1, 1]} : vector<2x128xf32> to vector<2x32xf32>
    %268 = math.tanh %267 : vector<2x32xf32>
    %269 = vector.extract_strided_slice %266 {offsets = [0, 0], sizes = [2, 32], strides = [1, 1]} : vector<2x96xf32> to vector<2x32xf32>
    %270 = vector.extract_strided_slice %266 {offsets = [0, 32], sizes = [2, 32], strides = [1, 1]} : vector<2x96xf32> to vector<2x32xf32>
    %271 = vector.extract_strided_slice %266 {offsets = [0, 64], sizes = [2, 32], strides = [1, 1]} : vector<2x96xf32> to vector<2x32xf32>
    %272 = arith.mulf %270, %249 : vector<2x32xf32>
    %273 = arith.mulf %269, %268 : vector<2x32xf32>
    %274 = arith.addf %272, %273 : vector<2x32xf32>
    %275 = math.tanh %274 : vector<2x32xf32>
    %276 = arith.mulf %271, %275 : vector<2x32xf32>
    %277 = arith.index_cast %c7_i32_97 : i32 to index
    %c0_102 = arith.constant 0 : index
    %c0_103 = arith.constant 0 : index
    %278 = vector.load %arg6[%277, %c0_102, %c0_103] : memref<8x2x32xf32, #tpu.memory_space<vmem>>, vector<1x2x32xf32>
    %279 = vector.shape_cast %278 : vector<1x2x32xf32> to vector<2x32xf32>
    %280 = vector.shape_cast %276 : vector<2x32xf32> to vector<1x2x32xf32>
    tpu.vector_store %arg6[%277, %c0_102, %c0_103], %280 {strides = array<i32>} : memref<8x2x32xf32, #tpu.memory_space<vmem>>, vector<1x2x32xf32>,
    %c8_i32_104 = arith.constant 8 : i32
    %c1 = arith.constant 1 : index
    %c0_105 = arith.constant 0 : index
    %c0_106 = arith.constant 0 : index
    %281 = vector.load %arg2[%c1, %c0_105, %c0_106] : memref<2x32x128xf32, #tpu.memory_space<vmem>>, vector<1x32x128xf32>
    %282 = vector.shape_cast %281 : vector<1x32x128xf32> to vector<32x128xf32>
    %c1_107 = arith.constant 1 : index
    %c0_108 = arith.constant 0 : index
    %c0_109 = arith.constant 0 : index
    %283 = vector.load %arg3[%c1_107, %c0_108, %c0_109] : memref<2x32x128xf32, #tpu.memory_space<vmem>>, vector<1x32x128xf32>
    %284 = vector.shape_cast %283 : vector<1x32x128xf32> to vector<32x128xf32>
    %c1_110 = arith.constant 1 : index
    %c0_111 = arith.constant 0 : index
    %c0_112 = arith.constant 0 : index
    %285 = vector.load %arg4[%c1_110, %c0_111, %c0_112] : memref<2x1x128xf32, #tpu.memory_space<vmem>>, vector<1x1x128xf32>
    %286 = vector.shape_cast %285 : vector<1x1x128xf32> to vector<1x128xf32>
    %287 = vector.shape_cast %286 : vector<1x128xf32> to vector<1x128xf32>
    %288 = vector.broadcast %287 : vector<1x128xf32> to vector<2x128xf32>
    %c0_i32_113 = arith.constant 0 : i32
    %289 = arith.index_cast %c0_i32_113 : i32 to index
    %c0_114 = arith.constant 0 : index
    %c0_115 = arith.constant 0 : index
    %290 = vector.load %arg6[%289, %c0_114, %c0_115] : memref<8x2x32xf32, #tpu.memory_space<vmem>>, vector<1x2x32xf32>
    %291 = vector.shape_cast %290 : vector<1x2x32xf32> to vector<2x32xf32>
    %cst_116 = arith.constant dense<0.000000e+00> : vector<2x128xf32>
    %292 = tpu.matmul %291, %282, %cst_116 {dimension_numbers = #tpu.dot_dimension_numbers<[1], [0], [0], [1], [0, 0, 1, 1], [], []>} : vector<2x32xf32>, vector<32x128xf32>, vector<2x128xf32> -> vector<2x128xf32>
    %293 = arith.addf %292, %288 : vector<2x128xf32>
    %294 = arith.index_cast %c0_i32_113 : i32 to index
    %c0_117 = arith.constant 0 : index
    %c0_118 = arith.constant 0 : index
    %295 = vector.load %arg7[%294, %c0_117, %c0_118] : memref<8x2x128xf32, #tpu.memory_space<vmem>>, vector<1x2x128xf32>
    %296 = vector.shape_cast %295 : vector<1x2x128xf32> to vector<2x128xf32>
    %297 = vector.shape_cast %293 : vector<2x128xf32> to vector<1x2x128xf32>
    tpu.vector_store %arg7[%294, %c0_117, %c0_118], %297 {strides = array<i32>} : memref<8x2x128xf32, #tpu.memory_space<vmem>>, vector<1x2x128xf32>,
    %c1_i32_119 = arith.constant 1 : i32
    %298 = arith.index_cast %c1_i32_119 : i32 to index
    %c0_120 = arith.constant 0 : index
    %c0_121 = arith.constant 0 : index
    %299 = vector.load %arg6[%298, %c0_120, %c0_121] : memref<8x2x32xf32, #tpu.memory_space<vmem>>, vector<1x2x32xf32>
    %300 = vector.shape_cast %299 : vector<1x2x32xf32> to vector<2x32xf32>
    %cst_122 = arith.constant dense<0.000000e+00> : vector<2x128xf32>
    %301 = tpu.matmul %300, %282, %cst_122 {dimension_numbers = #tpu.dot_dimension_numbers<[1], [0], [0], [1], [0, 0, 1, 1], [], []>} : vector<2x32xf32>, vector<32x128xf32>, vector<2x128xf32> -> vector<2x128xf32>
    %302 = arith.addf %301, %288 : vector<2x128xf32>
    %303 = arith.index_cast %c1_i32_119 : i32 to index
    %c0_123 = arith.constant 0 : index
    %c0_124 = arith.constant 0 : index
    %304 = vector.load %arg7[%303, %c0_123, %c0_124] : memref<8x2x128xf32, #tpu.memory_space<vmem>>, vector<1x2x128xf32>
    %305 = vector.shape_cast %304 : vector<1x2x128xf32> to vector<2x128xf32>
    %306 = vector.shape_cast %302 : vector<2x128xf32> to vector<1x2x128xf32>
    tpu.vector_store %arg7[%303, %c0_123, %c0_124], %306 {strides = array<i32>} : memref<8x2x128xf32, #tpu.memory_space<vmem>>, vector<1x2x128xf32>,
    %c2_i32_125 = arith.constant 2 : i32
    %307 = arith.index_cast %c2_i32_125 : i32 to index
    %c0_126 = arith.constant 0 : index
    %c0_127 = arith.constant 0 : index
    %308 = vector.load %arg6[%307, %c0_126, %c0_127] : memref<8x2x32xf32, #tpu.memory_space<vmem>>, vector<1x2x32xf32>
    %309 = vector.shape_cast %308 : vector<1x2x32xf32> to vector<2x32xf32>
    %cst_128 = arith.constant dense<0.000000e+00> : vector<2x128xf32>
    %310 = tpu.matmul %309, %282, %cst_128 {dimension_numbers = #tpu.dot_dimension_numbers<[1], [0], [0], [1], [0, 0, 1, 1], [], []>} : vector<2x32xf32>, vector<32x128xf32>, vector<2x128xf32> -> vector<2x128xf32>
    %311 = arith.addf %310, %288 : vector<2x128xf32>
    %312 = arith.index_cast %c2_i32_125 : i32 to index
    %c0_129 = arith.constant 0 : index
    %c0_130 = arith.constant 0 : index
    %313 = vector.load %arg7[%312, %c0_129, %c0_130] : memref<8x2x128xf32, #tpu.memory_space<vmem>>, vector<1x2x128xf32>
    %314 = vector.shape_cast %313 : vector<1x2x128xf32> to vector<2x128xf32>
    %315 = vector.shape_cast %311 : vector<2x128xf32> to vector<1x2x128xf32>
    tpu.vector_store %arg7[%312, %c0_129, %c0_130], %315 {strides = array<i32>} : memref<8x2x128xf32, #tpu.memory_space<vmem>>, vector<1x2x128xf32>,
    %c3_i32_131 = arith.constant 3 : i32
    %316 = arith.index_cast %c3_i32_131 : i32 to index
    %c0_132 = arith.constant 0 : index
    %c0_133 = arith.constant 0 : index
    %317 = vector.load %arg6[%316, %c0_132, %c0_133] : memref<8x2x32xf32, #tpu.memory_space<vmem>>, vector<1x2x32xf32>
    %318 = vector.shape_cast %317 : vector<1x2x32xf32> to vector<2x32xf32>
    %cst_134 = arith.constant dense<0.000000e+00> : vector<2x128xf32>
    %319 = tpu.matmul %318, %282, %cst_134 {dimension_numbers = #tpu.dot_dimension_numbers<[1], [0], [0], [1], [0, 0, 1, 1], [], []>} : vector<2x32xf32>, vector<32x128xf32>, vector<2x128xf32> -> vector<2x128xf32>
    %320 = arith.addf %319, %288 : vector<2x128xf32>
    %321 = arith.index_cast %c3_i32_131 : i32 to index
    %c0_135 = arith.constant 0 : index
    %c0_136 = arith.constant 0 : index
    %322 = vector.load %arg7[%321, %c0_135, %c0_136] : memref<8x2x128xf32, #tpu.memory_space<vmem>>, vector<1x2x128xf32>
    %323 = vector.shape_cast %322 : vector<1x2x128xf32> to vector<2x128xf32>
    %324 = vector.shape_cast %320 : vector<2x128xf32> to vector<1x2x128xf32>
    tpu.vector_store %arg7[%321, %c0_135, %c0_136], %324 {strides = array<i32>} : memref<8x2x128xf32, #tpu.memory_space<vmem>>, vector<1x2x128xf32>,
    %c4_i32_137 = arith.constant 4 : i32
    %325 = arith.index_cast %c4_i32_137 : i32 to index
    %c0_138 = arith.constant 0 : index
    %c0_139 = arith.constant 0 : index
    %326 = vector.load %arg6[%325, %c0_138, %c0_139] : memref<8x2x32xf32, #tpu.memory_space<vmem>>, vector<1x2x32xf32>
    %327 = vector.shape_cast %326 : vector<1x2x32xf32> to vector<2x32xf32>
    %cst_140 = arith.constant dense<0.000000e+00> : vector<2x128xf32>
    %328 = tpu.matmul %327, %282, %cst_140 {dimension_numbers = #tpu.dot_dimension_numbers<[1], [0], [0], [1], [0, 0, 1, 1], [], []>} : vector<2x32xf32>, vector<32x128xf32>, vector<2x128xf32> -> vector<2x128xf32>
    %329 = arith.addf %328, %288 : vector<2x128xf32>
    %330 = arith.index_cast %c4_i32_137 : i32 to index
    %c0_141 = arith.constant 0 : index
    %c0_142 = arith.constant 0 : index
    %331 = vector.load %arg7[%330, %c0_141, %c0_142] : memref<8x2x128xf32, #tpu.memory_space<vmem>>, vector<1x2x128xf32>
    %332 = vector.shape_cast %331 : vector<1x2x128xf32> to vector<2x128xf32>
    %333 = vector.shape_cast %329 : vector<2x128xf32> to vector<1x2x128xf32>
    tpu.vector_store %arg7[%330, %c0_141, %c0_142], %333 {strides = array<i32>} : memref<8x2x128xf32, #tpu.memory_space<vmem>>, vector<1x2x128xf32>,
    %c5_i32_143 = arith.constant 5 : i32
    %334 = arith.index_cast %c5_i32_143 : i32 to index
    %c0_144 = arith.constant 0 : index
    %c0_145 = arith.constant 0 : index
    %335 = vector.load %arg6[%334, %c0_144, %c0_145] : memref<8x2x32xf32, #tpu.memory_space<vmem>>, vector<1x2x32xf32>
    %336 = vector.shape_cast %335 : vector<1x2x32xf32> to vector<2x32xf32>
    %cst_146 = arith.constant dense<0.000000e+00> : vector<2x128xf32>
    %337 = tpu.matmul %336, %282, %cst_146 {dimension_numbers = #tpu.dot_dimension_numbers<[1], [0], [0], [1], [0, 0, 1, 1], [], []>} : vector<2x32xf32>, vector<32x128xf32>, vector<2x128xf32> -> vector<2x128xf32>
    %338 = arith.addf %337, %288 : vector<2x128xf32>
    %339 = arith.index_cast %c5_i32_143 : i32 to index
    %c0_147 = arith.constant 0 : index
    %c0_148 = arith.constant 0 : index
    %340 = vector.load %arg7[%339, %c0_147, %c0_148] : memref<8x2x128xf32, #tpu.memory_space<vmem>>, vector<1x2x128xf32>
    %341 = vector.shape_cast %340 : vector<1x2x128xf32> to vector<2x128xf32>
    %342 = vector.shape_cast %338 : vector<2x128xf32> to vector<1x2x128xf32>
    tpu.vector_store %arg7[%339, %c0_147, %c0_148], %342 {strides = array<i32>} : memref<8x2x128xf32, #tpu.memory_space<vmem>>, vector<1x2x128xf32>,
    %c6_i32_149 = arith.constant 6 : i32
    %343 = arith.index_cast %c6_i32_149 : i32 to index
    %c0_150 = arith.constant 0 : index
    %c0_151 = arith.constant 0 : index
    %344 = vector.load %arg6[%343, %c0_150, %c0_151] : memref<8x2x32xf32, #tpu.memory_space<vmem>>, vector<1x2x32xf32>
    %345 = vector.shape_cast %344 : vector<1x2x32xf32> to vector<2x32xf32>
    %cst_152 = arith.constant dense<0.000000e+00> : vector<2x128xf32>
    %346 = tpu.matmul %345, %282, %cst_152 {dimension_numbers = #tpu.dot_dimension_numbers<[1], [0], [0], [1], [0, 0, 1, 1], [], []>} : vector<2x32xf32>, vector<32x128xf32>, vector<2x128xf32> -> vector<2x128xf32>
    %347 = arith.addf %346, %288 : vector<2x128xf32>
    %348 = arith.index_cast %c6_i32_149 : i32 to index
    %c0_153 = arith.constant 0 : index
    %c0_154 = arith.constant 0 : index
    %349 = vector.load %arg7[%348, %c0_153, %c0_154] : memref<8x2x128xf32, #tpu.memory_space<vmem>>, vector<1x2x128xf32>
    %350 = vector.shape_cast %349 : vector<1x2x128xf32> to vector<2x128xf32>
    %351 = vector.shape_cast %347 : vector<2x128xf32> to vector<1x2x128xf32>
    tpu.vector_store %arg7[%348, %c0_153, %c0_154], %351 {strides = array<i32>} : memref<8x2x128xf32, #tpu.memory_space<vmem>>, vector<1x2x128xf32>,
    %c7_i32_155 = arith.constant 7 : i32
    %352 = arith.index_cast %c7_i32_155 : i32 to index
    %c0_156 = arith.constant 0 : index
    %c0_157 = arith.constant 0 : index
    %353 = vector.load %arg6[%352, %c0_156, %c0_157] : memref<8x2x32xf32, #tpu.memory_space<vmem>>, vector<1x2x32xf32>
    %354 = vector.shape_cast %353 : vector<1x2x32xf32> to vector<2x32xf32>
    %cst_158 = arith.constant dense<0.000000e+00> : vector<2x128xf32>
    %355 = tpu.matmul %354, %282, %cst_158 {dimension_numbers = #tpu.dot_dimension_numbers<[1], [0], [0], [1], [0, 0, 1, 1], [], []>} : vector<2x32xf32>, vector<32x128xf32>, vector<2x128xf32> -> vector<2x128xf32>
    %356 = arith.addf %355, %288 : vector<2x128xf32>
    %357 = arith.index_cast %c7_i32_155 : i32 to index
    %c0_159 = arith.constant 0 : index
    %c0_160 = arith.constant 0 : index
    %358 = vector.load %arg7[%357, %c0_159, %c0_160] : memref<8x2x128xf32, #tpu.memory_space<vmem>>, vector<1x2x128xf32>
    %359 = vector.shape_cast %358 : vector<1x2x128xf32> to vector<2x128xf32>
    %360 = vector.shape_cast %356 : vector<2x128xf32> to vector<1x2x128xf32>
    tpu.vector_store %arg7[%357, %c0_159, %c0_160], %360 {strides = array<i32>} : memref<8x2x128xf32, #tpu.memory_space<vmem>>, vector<1x2x128xf32>,
    %c8_i32_161 = arith.constant 8 : i32
    %cst_162 = arith.constant 0.000000e+00 : f32
    %361 = vector.broadcast %cst_162 : f32 to vector<2x32xf32>
    %c0_i32_163 = arith.constant 0 : i32
    %362 = arith.index_cast %c0_i32_163 : i32 to index
    %c0_164 = arith.constant 0 : index
    %c0_165 = arith.constant 0 : index
    %363 = vector.load %arg7[%362, %c0_164, %c0_165] : memref<8x2x128xf32, #tpu.memory_space<vmem>>, vector<1x2x128xf32>
    %364 = vector.shape_cast %363 : vector<1x2x128xf32> to vector<2x128xf32>
    %cst_166 = arith.constant dense<0.000000e+00> : vector<2x128xf32>
    %365 = tpu.matmul %361, %284, %cst_166 {dimension_numbers = #tpu.dot_dimension_numbers<[1], [0], [0], [1], [0, 0, 1, 1], [], []>} : vector<2x32xf32>, vector<32x128xf32>, vector<2x128xf32> -> vector<2x128xf32>
    %366 = arith.addf %364, %365 : vector<2x128xf32>
    %367 = vector.extract_strided_slice %366 {offsets = [0, 0], sizes = [2, 96], strides = [1, 1]} : vector<2x128xf32> to vector<2x96xf32>
    %368 = arith.negf %367 : vector<2x96xf32>
    %369 = math.exp %368 : vector<2x96xf32>
    %cst_167 = arith.constant 1.000000e+00 : f32
    %370 = vector.broadcast %cst_167 : f32 to vector<2x96xf32>
    %371 = arith.addf %370, %369 : vector<2x96xf32>
    %372 = arith.divf %370, %371 : vector<2x96xf32>
    %373 = vector.extract_strided_slice %366 {offsets = [0, 96], sizes = [2, 32], strides = [1, 1]} : vector<2x128xf32> to vector<2x32xf32>
    %374 = math.tanh %373 : vector<2x32xf32>
    %375 = vector.extract_strided_slice %372 {offsets = [0, 0], sizes = [2, 32], strides = [1, 1]} : vector<2x96xf32> to vector<2x32xf32>
    %376 = vector.extract_strided_slice %372 {offsets = [0, 32], sizes = [2, 32], strides = [1, 1]} : vector<2x96xf32> to vector<2x32xf32>
    %377 = vector.extract_strided_slice %372 {offsets = [0, 64], sizes = [2, 32], strides = [1, 1]} : vector<2x96xf32> to vector<2x32xf32>
    %378 = arith.mulf %376, %361 : vector<2x32xf32>
    %379 = arith.mulf %375, %374 : vector<2x32xf32>
    %380 = arith.addf %378, %379 : vector<2x32xf32>
    %381 = math.tanh %380 : vector<2x32xf32>
    %382 = arith.mulf %377, %381 : vector<2x32xf32>
    %383 = arith.index_cast %c0_i32_163 : i32 to index
    %c0_168 = arith.constant 0 : index
    %c0_169 = arith.constant 0 : index
    %384 = vector.load %arg5[%383, %c0_168, %c0_169] : memref<8x2x32xf32, #tpu.memory_space<vmem>>, vector<1x2x32xf32>
    %385 = vector.shape_cast %384 : vector<1x2x32xf32> to vector<2x32xf32>
    %386 = vector.shape_cast %382 : vector<2x32xf32> to vector<1x2x32xf32>
    tpu.vector_store %arg5[%383, %c0_168, %c0_169], %386 {strides = array<i32>} : memref<8x2x32xf32, #tpu.memory_space<vmem>>, vector<1x2x32xf32>,
    %c1_i32_170 = arith.constant 1 : i32
    %387 = arith.index_cast %c1_i32_170 : i32 to index
    %c0_171 = arith.constant 0 : index
    %c0_172 = arith.constant 0 : index
    %388 = vector.load %arg7[%387, %c0_171, %c0_172] : memref<8x2x128xf32, #tpu.memory_space<vmem>>, vector<1x2x128xf32>
    %389 = vector.shape_cast %388 : vector<1x2x128xf32> to vector<2x128xf32>
    %cst_173 = arith.constant dense<0.000000e+00> : vector<2x128xf32>
    %390 = tpu.matmul %382, %284, %cst_173 {dimension_numbers = #tpu.dot_dimension_numbers<[1], [0], [0], [1], [0, 0, 1, 1], [], []>} : vector<2x32xf32>, vector<32x128xf32>, vector<2x128xf32> -> vector<2x128xf32>
    %391 = arith.addf %389, %390 : vector<2x128xf32>
    %392 = vector.extract_strided_slice %391 {offsets = [0, 0], sizes = [2, 96], strides = [1, 1]} : vector<2x128xf32> to vector<2x96xf32>
    %393 = arith.negf %392 : vector<2x96xf32>
    %394 = math.exp %393 : vector<2x96xf32>
    %cst_174 = arith.constant 1.000000e+00 : f32
    %395 = vector.broadcast %cst_174 : f32 to vector<2x96xf32>
    %396 = arith.addf %395, %394 : vector<2x96xf32>
    %397 = arith.divf %395, %396 : vector<2x96xf32>
    %398 = vector.extract_strided_slice %391 {offsets = [0, 96], sizes = [2, 32], strides = [1, 1]} : vector<2x128xf32> to vector<2x32xf32>
    %399 = math.tanh %398 : vector<2x32xf32>
    %400 = vector.extract_strided_slice %397 {offsets = [0, 0], sizes = [2, 32], strides = [1, 1]} : vector<2x96xf32> to vector<2x32xf32>
    %401 = vector.extract_strided_slice %397 {offsets = [0, 32], sizes = [2, 32], strides = [1, 1]} : vector<2x96xf32> to vector<2x32xf32>
    %402 = vector.extract_strided_slice %397 {offsets = [0, 64], sizes = [2, 32], strides = [1, 1]} : vector<2x96xf32> to vector<2x32xf32>
    %403 = arith.mulf %401, %380 : vector<2x32xf32>
    %404 = arith.mulf %400, %399 : vector<2x32xf32>
    %405 = arith.addf %403, %404 : vector<2x32xf32>
    %406 = math.tanh %405 : vector<2x32xf32>
    %407 = arith.mulf %402, %406 : vector<2x32xf32>
    %408 = arith.index_cast %c1_i32_170 : i32 to index
    %c0_175 = arith.constant 0 : index
    %c0_176 = arith.constant 0 : index
    %409 = vector.load %arg5[%408, %c0_175, %c0_176] : memref<8x2x32xf32, #tpu.memory_space<vmem>>, vector<1x2x32xf32>
    %410 = vector.shape_cast %409 : vector<1x2x32xf32> to vector<2x32xf32>
    %411 = vector.shape_cast %407 : vector<2x32xf32> to vector<1x2x32xf32>
    tpu.vector_store %arg5[%408, %c0_175, %c0_176], %411 {strides = array<i32>} : memref<8x2x32xf32, #tpu.memory_space<vmem>>, vector<1x2x32xf32>,
    %c2_i32_177 = arith.constant 2 : i32
    %412 = arith.index_cast %c2_i32_177 : i32 to index
    %c0_178 = arith.constant 0 : index
    %c0_179 = arith.constant 0 : index
    %413 = vector.load %arg7[%412, %c0_178, %c0_179] : memref<8x2x128xf32, #tpu.memory_space<vmem>>, vector<1x2x128xf32>
    %414 = vector.shape_cast %413 : vector<1x2x128xf32> to vector<2x128xf32>
    %cst_180 = arith.constant dense<0.000000e+00> : vector<2x128xf32>
    %415 = tpu.matmul %407, %284, %cst_180 {dimension_numbers = #tpu.dot_dimension_numbers<[1], [0], [0], [1], [0, 0, 1, 1], [], []>} : vector<2x32xf32>, vector<32x128xf32>, vector<2x128xf32> -> vector<2x128xf32>
    %416 = arith.addf %414, %415 : vector<2x128xf32>
    %417 = vector.extract_strided_slice %416 {offsets = [0, 0], sizes = [2, 96], strides = [1, 1]} : vector<2x128xf32> to vector<2x96xf32>
    %418 = arith.negf %417 : vector<2x96xf32>
    %419 = math.exp %418 : vector<2x96xf32>
    %cst_181 = arith.constant 1.000000e+00 : f32
    %420 = vector.broadcast %cst_181 : f32 to vector<2x96xf32>
    %421 = arith.addf %420, %419 : vector<2x96xf32>
    %422 = arith.divf %420, %421 : vector<2x96xf32>
    %423 = vector.extract_strided_slice %416 {offsets = [0, 96], sizes = [2, 32], strides = [1, 1]} : vector<2x128xf32> to vector<2x32xf32>
    %424 = math.tanh %423 : vector<2x32xf32>
    %425 = vector.extract_strided_slice %422 {offsets = [0, 0], sizes = [2, 32], strides = [1, 1]} : vector<2x96xf32> to vector<2x32xf32>
    %426 = vector.extract_strided_slice %422 {offsets = [0, 32], sizes = [2, 32], strides = [1, 1]} : vector<2x96xf32> to vector<2x32xf32>
    %427 = vector.extract_strided_slice %422 {offsets = [0, 64], sizes = [2, 32], strides = [1, 1]} : vector<2x96xf32> to vector<2x32xf32>
    %428 = arith.mulf %426, %405 : vector<2x32xf32>
    %429 = arith.mulf %425, %424 : vector<2x32xf32>
    %430 = arith.addf %428, %429 : vector<2x32xf32>
    %431 = math.tanh %430 : vector<2x32xf32>
    %432 = arith.mulf %427, %431 : vector<2x32xf32>
    %433 = arith.index_cast %c2_i32_177 : i32 to index
    %c0_182 = arith.constant 0 : index
    %c0_183 = arith.constant 0 : index
    %434 = vector.load %arg5[%433, %c0_182, %c0_183] : memref<8x2x32xf32, #tpu.memory_space<vmem>>, vector<1x2x32xf32>
    %435 = vector.shape_cast %434 : vector<1x2x32xf32> to vector<2x32xf32>
    %436 = vector.shape_cast %432 : vector<2x32xf32> to vector<1x2x32xf32>
    tpu.vector_store %arg5[%433, %c0_182, %c0_183], %436 {strides = array<i32>} : memref<8x2x32xf32, #tpu.memory_space<vmem>>, vector<1x2x32xf32>,
    %c3_i32_184 = arith.constant 3 : i32
    %437 = arith.index_cast %c3_i32_184 : i32 to index
    %c0_185 = arith.constant 0 : index
    %c0_186 = arith.constant 0 : index
    %438 = vector.load %arg7[%437, %c0_185, %c0_186] : memref<8x2x128xf32, #tpu.memory_space<vmem>>, vector<1x2x128xf32>
    %439 = vector.shape_cast %438 : vector<1x2x128xf32> to vector<2x128xf32>
    %cst_187 = arith.constant dense<0.000000e+00> : vector<2x128xf32>
    %440 = tpu.matmul %432, %284, %cst_187 {dimension_numbers = #tpu.dot_dimension_numbers<[1], [0], [0], [1], [0, 0, 1, 1], [], []>} : vector<2x32xf32>, vector<32x128xf32>, vector<2x128xf32> -> vector<2x128xf32>
    %441 = arith.addf %439, %440 : vector<2x128xf32>
    %442 = vector.extract_strided_slice %441 {offsets = [0, 0], sizes = [2, 96], strides = [1, 1]} : vector<2x128xf32> to vector<2x96xf32>
    %443 = arith.negf %442 : vector<2x96xf32>
    %444 = math.exp %443 : vector<2x96xf32>
    %cst_188 = arith.constant 1.000000e+00 : f32
    %445 = vector.broadcast %cst_188 : f32 to vector<2x96xf32>
    %446 = arith.addf %445, %444 : vector<2x96xf32>
    %447 = arith.divf %445, %446 : vector<2x96xf32>
    %448 = vector.extract_strided_slice %441 {offsets = [0, 96], sizes = [2, 32], strides = [1, 1]} : vector<2x128xf32> to vector<2x32xf32>
    %449 = math.tanh %448 : vector<2x32xf32>
    %450 = vector.extract_strided_slice %447 {offsets = [0, 0], sizes = [2, 32], strides = [1, 1]} : vector<2x96xf32> to vector<2x32xf32>
    %451 = vector.extract_strided_slice %447 {offsets = [0, 32], sizes = [2, 32], strides = [1, 1]} : vector<2x96xf32> to vector<2x32xf32>
    %452 = vector.extract_strided_slice %447 {offsets = [0, 64], sizes = [2, 32], strides = [1, 1]} : vector<2x96xf32> to vector<2x32xf32>
    %453 = arith.mulf %451, %430 : vector<2x32xf32>
    %454 = arith.mulf %450, %449 : vector<2x32xf32>
    %455 = arith.addf %453, %454 : vector<2x32xf32>
    %456 = math.tanh %455 : vector<2x32xf32>
    %457 = arith.mulf %452, %456 : vector<2x32xf32>
    %458 = arith.index_cast %c3_i32_184 : i32 to index
    %c0_189 = arith.constant 0 : index
    %c0_190 = arith.constant 0 : index
    %459 = vector.load %arg5[%458, %c0_189, %c0_190] : memref<8x2x32xf32, #tpu.memory_space<vmem>>, vector<1x2x32xf32>
    %460 = vector.shape_cast %459 : vector<1x2x32xf32> to vector<2x32xf32>
    %461 = vector.shape_cast %457 : vector<2x32xf32> to vector<1x2x32xf32>
    tpu.vector_store %arg5[%458, %c0_189, %c0_190], %461 {strides = array<i32>} : memref<8x2x32xf32, #tpu.memory_space<vmem>>, vector<1x2x32xf32>,
    %c4_i32_191 = arith.constant 4 : i32
    %462 = arith.index_cast %c4_i32_191 : i32 to index
    %c0_192 = arith.constant 0 : index
    %c0_193 = arith.constant 0 : index
    %463 = vector.load %arg7[%462, %c0_192, %c0_193] : memref<8x2x128xf32, #tpu.memory_space<vmem>>, vector<1x2x128xf32>
    %464 = vector.shape_cast %463 : vector<1x2x128xf32> to vector<2x128xf32>
    %cst_194 = arith.constant dense<0.000000e+00> : vector<2x128xf32>
    %465 = tpu.matmul %457, %284, %cst_194 {dimension_numbers = #tpu.dot_dimension_numbers<[1], [0], [0], [1], [0, 0, 1, 1], [], []>} : vector<2x32xf32>, vector<32x128xf32>, vector<2x128xf32> -> vector<2x128xf32>
    %466 = arith.addf %464, %465 : vector<2x128xf32>
    %467 = vector.extract_strided_slice %466 {offsets = [0, 0], sizes = [2, 96], strides = [1, 1]} : vector<2x128xf32> to vector<2x96xf32>
    %468 = arith.negf %467 : vector<2x96xf32>
    %469 = math.exp %468 : vector<2x96xf32>
    %cst_195 = arith.constant 1.000000e+00 : f32
    %470 = vector.broadcast %cst_195 : f32 to vector<2x96xf32>
    %471 = arith.addf %470, %469 : vector<2x96xf32>
    %472 = arith.divf %470, %471 : vector<2x96xf32>
    %473 = vector.extract_strided_slice %466 {offsets = [0, 96], sizes = [2, 32], strides = [1, 1]} : vector<2x128xf32> to vector<2x32xf32>
    %474 = math.tanh %473 : vector<2x32xf32>
    %475 = vector.extract_strided_slice %472 {offsets = [0, 0], sizes = [2, 32], strides = [1, 1]} : vector<2x96xf32> to vector<2x32xf32>
    %476 = vector.extract_strided_slice %472 {offsets = [0, 32], sizes = [2, 32], strides = [1, 1]} : vector<2x96xf32> to vector<2x32xf32>
    %477 = vector.extract_strided_slice %472 {offsets = [0, 64], sizes = [2, 32], strides = [1, 1]} : vector<2x96xf32> to vector<2x32xf32>
    %478 = arith.mulf %476, %455 : vector<2x32xf32>
    %479 = arith.mulf %475, %474 : vector<2x32xf32>
    %480 = arith.addf %478, %479 : vector<2x32xf32>
    %481 = math.tanh %480 : vector<2x32xf32>
    %482 = arith.mulf %477, %481 : vector<2x32xf32>
    %483 = arith.index_cast %c4_i32_191 : i32 to index
    %c0_196 = arith.constant 0 : index
    %c0_197 = arith.constant 0 : index
    %484 = vector.load %arg5[%483, %c0_196, %c0_197] : memref<8x2x32xf32, #tpu.memory_space<vmem>>, vector<1x2x32xf32>
    %485 = vector.shape_cast %484 : vector<1x2x32xf32> to vector<2x32xf32>
    %486 = vector.shape_cast %482 : vector<2x32xf32> to vector<1x2x32xf32>
    tpu.vector_store %arg5[%483, %c0_196, %c0_197], %486 {strides = array<i32>} : memref<8x2x32xf32, #tpu.memory_space<vmem>>, vector<1x2x32xf32>,
    %c5_i32_198 = arith.constant 5 : i32
    %487 = arith.index_cast %c5_i32_198 : i32 to index
    %c0_199 = arith.constant 0 : index
    %c0_200 = arith.constant 0 : index
    %488 = vector.load %arg7[%487, %c0_199, %c0_200] : memref<8x2x128xf32, #tpu.memory_space<vmem>>, vector<1x2x128xf32>
    %489 = vector.shape_cast %488 : vector<1x2x128xf32> to vector<2x128xf32>
    %cst_201 = arith.constant dense<0.000000e+00> : vector<2x128xf32>
    %490 = tpu.matmul %482, %284, %cst_201 {dimension_numbers = #tpu.dot_dimension_numbers<[1], [0], [0], [1], [0, 0, 1, 1], [], []>} : vector<2x32xf32>, vector<32x128xf32>, vector<2x128xf32> -> vector<2x128xf32>
    %491 = arith.addf %489, %490 : vector<2x128xf32>
    %492 = vector.extract_strided_slice %491 {offsets = [0, 0], sizes = [2, 96], strides = [1, 1]} : vector<2x128xf32> to vector<2x96xf32>
    %493 = arith.negf %492 : vector<2x96xf32>
    %494 = math.exp %493 : vector<2x96xf32>
    %cst_202 = arith.constant 1.000000e+00 : f32
    %495 = vector.broadcast %cst_202 : f32 to vector<2x96xf32>
    %496 = arith.addf %495, %494 : vector<2x96xf32>
    %497 = arith.divf %495, %496 : vector<2x96xf32>
    %498 = vector.extract_strided_slice %491 {offsets = [0, 96], sizes = [2, 32], strides = [1, 1]} : vector<2x128xf32> to vector<2x32xf32>
    %499 = math.tanh %498 : vector<2x32xf32>
    %500 = vector.extract_strided_slice %497 {offsets = [0, 0], sizes = [2, 32], strides = [1, 1]} : vector<2x96xf32> to vector<2x32xf32>
    %501 = vector.extract_strided_slice %497 {offsets = [0, 32], sizes = [2, 32], strides = [1, 1]} : vector<2x96xf32> to vector<2x32xf32>
    %502 = vector.extract_strided_slice %497 {offsets = [0, 64], sizes = [2, 32], strides = [1, 1]} : vector<2x96xf32> to vector<2x32xf32>
    %503 = arith.mulf %501, %480 : vector<2x32xf32>
    %504 = arith.mulf %500, %499 : vector<2x32xf32>
    %505 = arith.addf %503, %504 : vector<2x32xf32>
    %506 = math.tanh %505 : vector<2x32xf32>
    %507 = arith.mulf %502, %506 : vector<2x32xf32>
    %508 = arith.index_cast %c5_i32_198 : i32 to index
    %c0_203 = arith.constant 0 : index
    %c0_204 = arith.constant 0 : index
    %509 = vector.load %arg5[%508, %c0_203, %c0_204] : memref<8x2x32xf32, #tpu.memory_space<vmem>>, vector<1x2x32xf32>
    %510 = vector.shape_cast %509 : vector<1x2x32xf32> to vector<2x32xf32>
    %511 = vector.shape_cast %507 : vector<2x32xf32> to vector<1x2x32xf32>
    tpu.vector_store %arg5[%508, %c0_203, %c0_204], %511 {strides = array<i32>} : memref<8x2x32xf32, #tpu.memory_space<vmem>>, vector<1x2x32xf32>,
    %c6_i32_205 = arith.constant 6 : i32
    %512 = arith.index_cast %c6_i32_205 : i32 to index
    %c0_206 = arith.constant 0 : index
    %c0_207 = arith.constant 0 : index
    %513 = vector.load %arg7[%512, %c0_206, %c0_207] : memref<8x2x128xf32, #tpu.memory_space<vmem>>, vector<1x2x128xf32>
    %514 = vector.shape_cast %513 : vector<1x2x128xf32> to vector<2x128xf32>
    %cst_208 = arith.constant dense<0.000000e+00> : vector<2x128xf32>
    %515 = tpu.matmul %507, %284, %cst_208 {dimension_numbers = #tpu.dot_dimension_numbers<[1], [0], [0], [1], [0, 0, 1, 1], [], []>} : vector<2x32xf32>, vector<32x128xf32>, vector<2x128xf32> -> vector<2x128xf32>
    %516 = arith.addf %514, %515 : vector<2x128xf32>
    %517 = vector.extract_strided_slice %516 {offsets = [0, 0], sizes = [2, 96], strides = [1, 1]} : vector<2x128xf32> to vector<2x96xf32>
    %518 = arith.negf %517 : vector<2x96xf32>
    %519 = math.exp %518 : vector<2x96xf32>
    %cst_209 = arith.constant 1.000000e+00 : f32
    %520 = vector.broadcast %cst_209 : f32 to vector<2x96xf32>
    %521 = arith.addf %520, %519 : vector<2x96xf32>
    %522 = arith.divf %520, %521 : vector<2x96xf32>
    %523 = vector.extract_strided_slice %516 {offsets = [0, 96], sizes = [2, 32], strides = [1, 1]} : vector<2x128xf32> to vector<2x32xf32>
    %524 = math.tanh %523 : vector<2x32xf32>
    %525 = vector.extract_strided_slice %522 {offsets = [0, 0], sizes = [2, 32], strides = [1, 1]} : vector<2x96xf32> to vector<2x32xf32>
    %526 = vector.extract_strided_slice %522 {offsets = [0, 32], sizes = [2, 32], strides = [1, 1]} : vector<2x96xf32> to vector<2x32xf32>
    %527 = vector.extract_strided_slice %522 {offsets = [0, 64], sizes = [2, 32], strides = [1, 1]} : vector<2x96xf32> to vector<2x32xf32>
    %528 = arith.mulf %526, %505 : vector<2x32xf32>
    %529 = arith.mulf %525, %524 : vector<2x32xf32>
    %530 = arith.addf %528, %529 : vector<2x32xf32>
    %531 = math.tanh %530 : vector<2x32xf32>
    %532 = arith.mulf %527, %531 : vector<2x32xf32>
    %533 = arith.index_cast %c6_i32_205 : i32 to index
    %c0_210 = arith.constant 0 : index
    %c0_211 = arith.constant 0 : index
    %534 = vector.load %arg5[%533, %c0_210, %c0_211] : memref<8x2x32xf32, #tpu.memory_space<vmem>>, vector<1x2x32xf32>
    %535 = vector.shape_cast %534 : vector<1x2x32xf32> to vector<2x32xf32>
    %536 = vector.shape_cast %532 : vector<2x32xf32> to vector<1x2x32xf32>
    tpu.vector_store %arg5[%533, %c0_210, %c0_211], %536 {strides = array<i32>} : memref<8x2x32xf32, #tpu.memory_space<vmem>>, vector<1x2x32xf32>,
    %c7_i32_212 = arith.constant 7 : i32
    %537 = arith.index_cast %c7_i32_212 : i32 to index
    %c0_213 = arith.constant 0 : index
    %c0_214 = arith.constant 0 : index
    %538 = vector.load %arg7[%537, %c0_213, %c0_214] : memref<8x2x128xf32, #tpu.memory_space<vmem>>, vector<1x2x128xf32>
    %539 = vector.shape_cast %538 : vector<1x2x128xf32> to vector<2x128xf32>
    %cst_215 = arith.constant dense<0.000000e+00> : vector<2x128xf32>
    %540 = tpu.matmul %532, %284, %cst_215 {dimension_numbers = #tpu.dot_dimension_numbers<[1], [0], [0], [1], [0, 0, 1, 1], [], []>} : vector<2x32xf32>, vector<32x128xf32>, vector<2x128xf32> -> vector<2x128xf32>
    %541 = arith.addf %539, %540 : vector<2x128xf32>
    %542 = vector.extract_strided_slice %541 {offsets = [0, 0], sizes = [2, 96], strides = [1, 1]} : vector<2x128xf32> to vector<2x96xf32>
    %543 = arith.negf %542 : vector<2x96xf32>
    %544 = math.exp %543 : vector<2x96xf32>
    %cst_216 = arith.constant 1.000000e+00 : f32
    %545 = vector.broadcast %cst_216 : f32 to vector<2x96xf32>
    %546 = arith.addf %545, %544 : vector<2x96xf32>
    %547 = arith.divf %545, %546 : vector<2x96xf32>
    %548 = vector.extract_strided_slice %541 {offsets = [0, 96], sizes = [2, 32], strides = [1, 1]} : vector<2x128xf32> to vector<2x32xf32>
    %549 = math.tanh %548 : vector<2x32xf32>
    %550 = vector.extract_strided_slice %547 {offsets = [0, 0], sizes = [2, 32], strides = [1, 1]} : vector<2x96xf32> to vector<2x32xf32>
    %551 = vector.extract_strided_slice %547 {offsets = [0, 32], sizes = [2, 32], strides = [1, 1]} : vector<2x96xf32> to vector<2x32xf32>
    %552 = vector.extract_strided_slice %547 {offsets = [0, 64], sizes = [2, 32], strides = [1, 1]} : vector<2x96xf32> to vector<2x32xf32>
    %553 = arith.mulf %551, %530 : vector<2x32xf32>
    %554 = arith.mulf %550, %549 : vector<2x32xf32>
    %555 = arith.addf %553, %554 : vector<2x32xf32>
    %556 = math.tanh %555 : vector<2x32xf32>
    %557 = arith.mulf %552, %556 : vector<2x32xf32>
    %558 = arith.index_cast %c7_i32_212 : i32 to index
    %c0_217 = arith.constant 0 : index
    %c0_218 = arith.constant 0 : index
    %559 = vector.load %arg5[%558, %c0_217, %c0_218] : memref<8x2x32xf32, #tpu.memory_space<vmem>>, vector<1x2x32xf32>
    %560 = vector.shape_cast %559 : vector<1x2x32xf32> to vector<2x32xf32>
    %561 = vector.shape_cast %557 : vector<2x32xf32> to vector<1x2x32xf32>
    tpu.vector_store %arg5[%558, %c0_217, %c0_218], %561 {strides = array<i32>} : memref<8x2x32xf32, #tpu.memory_space<vmem>>, vector<1x2x32xf32>,
    %c8_i32_219 = arith.constant 8 : i32
    return
  }
  func.func @transform_0(%arg0: i32) -> (i32, i32, i32) {
    %c0_i32 = arith.constant 0 : i32
    %c0_i32_0 = arith.constant 0 : i32
    %c0_i32_1 = arith.constant 0 : i32
    return %c0_i32, %arg0, %c0_i32_0 : i32, i32, i32
  }
  func.func @transform_1(%arg0: i32) -> (i32, i32, i32) {
    %c0_i32 = arith.constant 0 : i32
    %c0_i32_0 = arith.constant 0 : i32
    %c0_i32_1 = arith.constant 0 : i32
    %c0_i32_2 = arith.constant 0 : i32
    return %c0_i32, %c0_i32_0, %c0_i32_1 : i32, i32, i32
  }
  func.func @transform_2(%arg0: i32) -> (i32, i32, i32) {
    %c0_i32 = arith.constant 0 : i32
    %c0_i32_0 = arith.constant 0 : i32
    %c0_i32_1 = arith.constant 0 : i32
    %c0_i32_2 = arith.constant 0 : i32
    return %c0_i32, %c0_i32_0, %c0_i32_1 : i32, i32, i32
  }
  func.func @transform_3(%arg0: i32) -> (i32, i32, i32) {
    %c0_i32 = arith.constant 0 : i32
    %c0_i32_0 = arith.constant 0 : i32
    %c0_i32_1 = arith.constant 0 : i32
    %c0_i32_2 = arith.constant 0 : i32
    return %c0_i32, %c0_i32_0, %c0_i32_1 : i32, i32, i32
  }
  func.func @transform_4(%arg0: i32) -> (i32, i32, i32) {
    %c0_i32 = arith.constant 0 : i32
    %c0_i32_0 = arith.constant 0 : i32
    %c0_i32_1 = arith.constant 0 : i32
    return %c0_i32, %arg0, %c0_i32_0 : i32, i32, i32
  }
}

</mosaic_0001>

<bundles_post_ra>
// kernel: tpu_custom_call.1
= control target key start
LH: loop header
LB: loop body
LE: loop exit
PB: predicated region body
PF: predicated region fallthrough
CT: control target
= control target key end

     0   :  { %9 = vsyncpa [#allocation5], 0  ;;  %s4329_s0 = inlined_call_operand.hbm [shape: f32[8,2,32], index: 0, kind: input, shape index: {}]   ;;  %s4330_s1 = inlined_call_operand.hbm [shape: f32[2,32,128], index: 1, kind: input, shape index: {}]   ;;  %s4331_s2 = inlined_call_operand.hbm [shape: f32[2,32,128], index: 2, kind: input, shape index: {}]   ;;  %s4332_s3 = inlined_call_operand.vmem [shape: f32[2,1,128], index: 3, kind: input, shape index: {}]   ;;  %s4333_s4 = inlined_call_operand.hbm [shape: f32[8,2,32], index: 4, kind: output, shape index: {}]  }
   0x1   :  { %10 = vsyncpa [#allocation8], 0 }
   0x2   :  { %11 = vsyncpa [#allocation6], 0  ;;  %s3773_s15 = smov [#allocation7]  }
   0x3   :  { %s29_s16 = sshll.u32 %s3773_s15, 4  ;;  %s30_s16 = int_to_ptr.vmem [resolvable:$true] %s29_s16 }
   0x4   :  { %s3695_s17 = scalar_lea.vmem %s30_s16, 1024  ;;  %p3700_p1 = scmp.lt.s32.totalorder %s30_s16, %s30_s16 }
   0x5   :  { %p3696_p0 = scmp.ne.s32.totalorder %s30_s16, %s3695_s17  ;;  %p3701_p2 = scmp.lt.s32.totalorder %s3695_s17, %s3695_s17 }
   0x7   :  { %p3702_p3 = por %p3701_p2, %p3700_p1 }
   0x9   :  { %p3703_p4 = pnand %p3702_p3, %p3696_p0 }
   0xb   :  { %3706 = shalt.err (!%p3703_p4)
}
   0xc   :  { %s3774_s18 = smov 128   ;;  %s3775_s19 = smov 8  }
   0xd   :  { %35 = dma.hbm_to_vmem [thread:$0]  %s4330_s1, 1024, %s30_s16, [#allocation8], %s3774_s18, %s3774_s18, %s3775_s19  }
   0xe   :  { %s3776_s22 = smov [#allocation4]  }
   0xf   :  { %s17_s23 = sshll.u32 %s3776_s22, 4  ;;  %s18_s23 = int_to_ptr.vmem [resolvable:$true] %s17_s23 }
  0x10   :  { %s3715_s24 = scalar_lea.vmem %s18_s23, 256  ;;  %p3720_p6 = scmp.lt.s32.totalorder %s18_s23, %s18_s23 }
  0x11   :  { %p3716_p5 = scmp.ne.s32.totalorder %s18_s23, %s3715_s24  ;;  %p3721_p7 = scmp.lt.s32.totalorder %s3715_s24, %s3715_s24 }
  0x13   :  { %p3722_p8 = por %p3721_p7, %p3720_p6 }
  0x15   :  { %p3723_p9 = pnand %p3722_p8, %p3716_p5 }
  0x17   :  { %3726 = shalt.err (!%p3723_p9)
}
  0x18   :  { %s3777_s25 = smov 32   ;;  %s3778_s26 = smov 2  }
  0x19   :  { %23 = dma.hbm_to_vmem [thread:$0]  %s4329_s0, 256, %s18_s23, [#allocation5], %s3777_s25, %s3777_s25, %s3778_s26  }
  0x1a   :  { %s3779_s1 = smov [#allocation9]  }
  0x1b   :  { %s41_s29 = sshll.u32 %s3779_s1, 4  ;;  %s42_s29 = int_to_ptr.vmem [resolvable:$true] %s41_s29 }
  0x1c   :  { %s3735_s30 = scalar_lea.vmem %s42_s29, 1024  ;;  %p3740_p11 = scmp.lt.s32.totalorder %s42_s29, %s42_s29 }
  0x1d   :  { %p3736_p10 = scmp.ne.s32.totalorder %s42_s29, %s3735_s30  ;;  %p3741_p12 = scmp.lt.s32.totalorder %s3735_s30, %s3735_s30 }
  0x1f   :  { %p3742_p13 = por %p3741_p12, %p3740_p11 }
  0x21   :  { %p3743_p0 = pnand %p3742_p13, %p3736_p10 }
  0x23   :  { %3746 = shalt.err (!%p3743_p0)
}
  0x24   :  { %47 = dma.hbm_to_vmem [thread:$0]  %s4331_s2, 1024, %s42_s29, [#allocation8], %s3774_s18, %s3774_s18, %s3775_s19  }
  0x25   :  { %3767 = dma.done.wait [#allocation5], 256  }
  0x26   :  { %3768 = vsyncadd [#allocation5], 4294967040 }
  0x27   :  { %3769 = dma.done.wait [#allocation8], 2048  }
  0x28   :  { %3770 = vsyncadd [#allocation8], 4294965248  ;;  %v3780_v0 = vmov 0.0   ;;  %vm3781_vm0 = vmmov 0   ;;  %v3827_v1 = vld [vmem:[#allocation7 + $0x18] sm:$0xff]  ;;  %v3829_v2 = vld [vmem:[#allocation7 + $0x10] sm:$0xff] }
  0x29   :  { %3196 = vmatprep.subr.mxu0 %v3780_v0  ;;  %3204 = vmatprep.mubr.msk.f32.mxu0 %vm3781_vm0, %v3780_v0  ;;  %v3834_v3 = vld [vmem:[#allocation7 + $0x8] sm:$0xff]  ;;  %v3840_v4 = vld [vmem:[#allocation7] sm:$0xff]  ;;  %v74_v5 = vld [vmem:[#allocation4] sm:$0x3]  ;;  %vm75_vm1 = vcmask 261120   ;;  %s3782_s7 = smov 64  }
  0x2a   :  { %3207 = vmatprep.subr.mxu1 %v3780_v0  ;;  %3215 = vmatprep.mubr.msk.f32.mxu1 %vm3781_vm0, %v3780_v0  ;;  %v228_v6 = vld [vmem:[#allocation4 + $0x4] sm:$0x3]  ;;  %v382_v7 = vld [vmem:[#allocation4 + $0x8] sm:$0x3]  ;;  %v536_v8 = vld [vmem:[#allocation4 + $0xc] sm:$0x3] }
  0x2b   :  { %3197 = vmatpush3.msra.mxu0 %v3827_v1  ;;  %3208 = vmatpush3.msra.mxu1 %v3827_v1  ;;  %v3882_v9 = vld [vmem:[#allocation9 + $0x18] sm:$0xff]  ;;  %v3887_v10 = vld [vmem:[#allocation9 + $0x10] sm:$0xff]  ;;  %v3893_v11 = vld [vmem:[#allocation9 + $0x8] sm:$0xff]  ;;  %vm792_vm2 = vcmask 254976  }
  0x2c   :  { %3198 = vmatprep.subr.mxu0 %v3780_v0  ;;  %3209 = vmatprep.subr.mxu1 %v3780_v0  ;;  %v3897_v12 = vld [vmem:[#allocation9] sm:$0xff]  ;;  %v3917_v13 = vld [vmem:[%s4332_s3] ss:$0 sm:$0xff]  ;;  %v151_v40 = vld [vmem:[#allocation4 + $0x2] sm:$0x3] }
  0x2d   :  { %3199 = vmatpush3.msra.mxu0 %v3829_v2  ;;  %3210 = vmatpush3.msra.mxu1 %v3829_v2  ;;  %v305_v41 = vld [vmem:[#allocation4 + $0x6] sm:$0x3]  ;;  %v459_v43 = vld [vmem:[#allocation4 + $0xa] sm:$0x3]  ;;  %v613_v44 = vld [vmem:[#allocation4 + $0xe] sm:$0x3] }
  0x2e   :  { %3200 = vmatprep.subr.mxu0 %v3780_v0  ;;  %3211 = vmatprep.subr.mxu1 %v3780_v0 }
  0x2f   :  { %3201 = vmatpush3.msra.mxu0 %v3834_v3  ;;  %3212 = vmatpush3.msra.mxu1 %v3834_v3 }
  0x30   :  { %3202 = vmatprep.subr.mxu0 %v3780_v0  ;;  %3213 = vmatprep.subr.mxu1 %v3780_v0 }
  0x31   :  { %3203 = vmatpush3.msra.mxu0 %v3840_v4  ;;  %3214 = vmatpush3.msra.mxu1 %v3840_v4 }
  0x32   :  { %3205 = vmatmul.mubr.msk.f32.vlgmr.msra.gmra.mxu0 %vm75_vm1, %v74_v5  ;;  %3218 = vmatprep.subr.mxu0 %v3780_v0 }
  0x33   :  { %3219 = vmatpush3.msra.mxu0 %v3827_v1  ;;  %3226 = vmatprep.mubr.msk.f32.mxu0 %vm3781_vm0, %v3780_v0 }
  0x34   :  { %3220 = vmatprep.subr.mxu0 %v3780_v0  ;;  %3229 = vmatprep.subr.mxu1 %v3780_v0 }
  0x35   :  { %3221 = vmatpush3.msra.mxu0 %v3829_v2  ;;  %3216 = vmatmul.mubr.msk.f32.vlgmr.msra.gmra.mxu1 %vm75_vm1, %v151_v40 }
  0x36   :  { %3222 = vmatprep.subr.mxu0 %v3780_v0  ;;  %3230 = vmatpush3.msra.mxu1 %v3827_v1 }
  0x37   :  { %3223 = vmatpush3.msra.mxu0 %v3834_v3  ;;  %3237 = vmatprep.mubr.msk.f32.mxu1 %vm3781_vm0, %v3780_v0 }
  0x38   :  { %3224 = vmatprep.subr.mxu0 %v3780_v0  ;;  %3231 = vmatprep.subr.mxu1 %v3780_v0 }
  0x39   :  { %3225 = vmatpush3.msra.mxu0 %v3840_v4  ;;  %3232 = vmatpush3.msra.mxu1 %v3829_v2 }
  0x3a   :  { %3227 = vmatmul.mubr.msk.f32.vlgmr.msra.gmra.mxu0 %vm75_vm1, %v228_v6  ;;  %3240 = vmatprep.subr.mxu0 %v3780_v0 }
  0x3b   :  { %3241 = vmatpush3.msra.mxu0 %v3827_v1  ;;  %3248 = vmatprep.mubr.msk.f32.mxu0 %vm3781_vm0, %v3780_v0 }
  0x3c   :  { %3242 = vmatprep.subr.mxu0 %v3780_v0  ;;  %3233 = vmatprep.subr.mxu1 %v3780_v0 }
  0x3d   :  { %3243 = vmatpush3.msra.mxu0 %v3829_v2  ;;  %3234 = vmatpush3.msra.mxu1 %v3834_v3 }
  0x3e   :  { %3244 = vmatprep.subr.mxu0 %v3780_v0  ;;  %3235 = vmatprep.subr.mxu1 %v3780_v0 }
  0x3f   :  { %3245 = vmatpush3.msra.mxu0 %v3834_v3  ;;  %3236 = vmatpush3.msra.mxu1 %v3840_v4 }
  0x40   :  { %3246 = vmatprep.subr.mxu0 %v3780_v0  ;;  %3238 = vmatmul.mubr.msk.f32.vlgmr.msra.gmra.mxu1 %vm75_vm1, %v305_v41 }
  0x41   :  { %3247 = vmatpush3.msra.mxu0 %v3840_v4  ;;  %3251 = vmatprep.subr.mxu1 %v3780_v0 }
  0x42   :  { %3249 = vmatmul.mubr.msk.f32.vlgmr.msra.gmra.mxu0 %vm75_vm1, %v382_v7  ;;  %3262 = vmatprep.subr.mxu0 %v3780_v0 }
  0x43   :  { %3263 = vmatpush3.msra.mxu0 %v3827_v1  ;;  %3270 = vmatprep.mubr.msk.f32.mxu0 %vm3781_vm0, %v3780_v0 }
  0x44   :  { %3264 = vmatprep.subr.mxu0 %v3780_v0  ;;  %3252 = vmatpush3.msra.mxu1 %v3827_v1 }
  0x45   :  { %3265 = vmatpush3.msra.mxu0 %v3829_v2  ;;  %3259 = vmatprep.mubr.msk.f32.mxu1 %vm3781_vm0, %v3780_v0 }
  0x46   :  { %3266 = vmatprep.subr.mxu0 %v3780_v0  ;;  %3253 = vmatprep.subr.mxu1 %v3780_v0 }
  0x47   :  { %3267 = vmatpush3.msra.mxu0 %v3834_v3  ;;  %3254 = vmatpush3.msra.mxu1 %v3829_v2 }
  0x48   :  { %3268 = vmatprep.subr.mxu0 %v3780_v0  ;;  %3255 = vmatprep.subr.mxu1 %v3780_v0 }
  0x49   :  { %3269 = vmatpush3.msra.mxu0 %v3840_v4  ;;  %3256 = vmatpush3.msra.mxu1 %v3834_v3 }
  0x4a   :  { %3271 = vmatmul.mubr.msk.f32.vlgmr.msra.gmra.mxu0 %vm75_vm1, %v536_v8  ;;  %3284 = vmatprep.subr.mxu0 %v3780_v0 }
  0x4b   :  { %3285 = vmatpush3.msra.mxu0 %v3882_v9  ;;  %3292 = vmatprep.mubr.msk.f32.mxu0 %vm3781_vm0, %v3780_v0 }
  0x4c   :  { %3286 = vmatprep.subr.mxu0 %v3780_v0  ;;  %3257 = vmatprep.subr.mxu1 %v3780_v0 }
  0x4d   :  { %3287 = vmatpush3.msra.mxu0 %v3887_v10  ;;  %3258 = vmatpush3.msra.mxu1 %v3840_v4 }
  0x4e   :  { %3288 = vmatprep.subr.mxu0 %v3780_v0  ;;  %3260 = vmatmul.mubr.msk.f32.vlgmr.msra.gmra.mxu1 %vm75_vm1, %v459_v43 }
  0x4f   :  { %3289 = vmatpush3.msra.mxu0 %v3893_v11  ;;  %3273 = vmatprep.subr.mxu1 %v3780_v0 }
  0x50   :  { %3290 = vmatprep.subr.mxu0 %v3780_v0  ;;  %3274 = vmatpush3.msra.mxu1 %v3827_v1 }
  0x51   :  { %3291 = vmatpush3.msra.mxu0 %v3897_v12  ;;  %3281 = vmatprep.mubr.msk.f32.mxu1 %vm3781_vm0, %v3780_v0 }
  0x52   :  { %3293 = vmatmul.mubr.f32.vlgmr.msra.gmra.mxu0 %v3780_v0  ;;  %3306 = vmatprep.subr.mxu0 %v3780_v0 }
  0x53   :  { %3307 = vmatpush3.msra.mxu0 %v3882_v9  ;;  %3314 = vmatprep.mubr.msk.f32.mxu0 %vm3781_vm0, %v3780_v0 }
  0x54   :  { %3308 = vmatprep.subr.mxu0 %v3780_v0  ;;  %3275 = vmatprep.subr.mxu1 %v3780_v0 }
  0x55   :  { %3309 = vmatpush3.msra.mxu0 %v3887_v10  ;;  %3276 = vmatpush3.msra.mxu1 %v3829_v2 }
  0x56   :  { %3310 = vmatprep.subr.mxu0 %v3780_v0  ;;  %3277 = vmatprep.subr.mxu1 %v3780_v0 }
  0x57   :  { %3311 = vmatpush3.msra.mxu0 %v3893_v11  ;;  %3278 = vmatpush3.msra.mxu1 %v3834_v3 }
  0x58   :  { %3312 = vmatprep.subr.mxu0 %v3780_v0  ;;  %3279 = vmatprep.subr.mxu1 %v3780_v0 }
  0x59   :  { %3313 = vmatpush3.msra.mxu0 %v3897_v12  ;;  %3280 = vmatpush3.msra.mxu1 %v3840_v4 }
  0x5a   :  { %3328 = vmatprep.subr.mxu0 %v3780_v0  ;;  %3282 = vmatmul.mubr.msk.f32.vlgmr.msra.gmra.mxu1 %vm75_vm1, %v613_v44 }
  0x5b   :  { %3295 = vmatprep.subr.mxu1 %v3780_v0  ;;  %3303 = vmatprep.mubr.msk.f32.mxu1 %vm3781_vm0, %v3780_v0 }
  0x5c   :  { %3296 = vmatpush3.msra.mxu1 %v3882_v9 }
  0x5d   :  { %3297 = vmatprep.subr.mxu1 %v3780_v0 }
  0x5e   :  { %3298 = vmatpush3.msra.mxu1 %v3887_v10 }
  0x5f   :  { %3299 = vmatprep.subr.mxu1 %v3780_v0 }
  0x60   :  { %3300 = vmatpush3.msra.mxu1 %v3893_v11 }
  0x61   :  { %3301 = vmatprep.subr.mxu1 %v3780_v0 }
  0x62   :  { %3302 = vmatpush3.msra.mxu1 %v3897_v12 }
  0x63   :  { %3317 = vmatprep.subr.mxu1 %v3780_v0 }
  0xf2   :  { %v145_v14 = vpop.f32.mrf.mxu0 }
  0xf3   :  { %v146_v15 = vadd.f32 %v3917_v13, %v145_v14 }
  0xf4   :  { %v3206_v16 = vpop.f32.mrf.mxu0 }
  0xf5   :  { %149 = vst [vmem:[#allocation3] sm:$0x3] %v146_v15  ;;  %v221_v47 = vpop.f32.mrf.mxu1 }
  0xf6   :  { %v222_v48 = vadd.f32 %v3917_v13, %v221_v47 }
  0xf7   :  { %v3217_v49 = vpop.f32.mrf.mxu1 }
  0xf8   :  { %226 = vst [vmem:[#allocation3 + $0x2] sm:$0x3] %v222_v48 }
  0xfa   :  { %v298_v17 = vpop.f32.mrf.mxu0 }
  0xfb   :  { %v299_v18 = vadd.f32 %v3917_v13, %v298_v17 }
  0xfc   :  { %v3228_v19 = vpop.f32.mrf.mxu0  ;;  %v689_v26 = vld [vmem:[#allocation3] sm:$0x3] }
  0xfd   :  { %303 = vst [vmem:[#allocation3 + $0x4] sm:$0x3] %v299_v18 }
  0xff   :  { %v794_v60 = vld [vmem:[#allocation3 + $0x2] sm:$0x3] }
 0x100   :  { %v375_v50 = vpop.f32.mrf.mxu1 }
 0x101   :  { %v376_v51 = vadd.f32 %v3917_v13, %v375_v50 }
 0x102   :  { %v452_v20 = vpop.f32.mrf.mxu0  ;;  %v3239_v52 = vpop.f32.mrf.mxu1 }
 0x103   :  { %v453_v21 = vadd.f32 %v3917_v13, %v452_v20  ;;  %380 = vst [vmem:[#allocation3 + $0x6] sm:$0x3] %v376_v51 }
 0x104   :  { %v3250_v22 = vpop.f32.mrf.mxu0  ;;  %v898_v19 = vld [vmem:[#allocation3 + $0x4] sm:$0x3] }
 0x105   :  { %457 = vst [vmem:[#allocation3 + $0x8] sm:$0x3] %v453_v21 }
 0x10a   :  { %v606_v23 = vpop.f32.mrf.mxu0 }
 0x10b   :  { %v607_v24 = vadd.f32 %v3917_v13, %v606_v23 }
 0x10c   :  { %v3272_v25 = vpop.f32.mrf.mxu0 }
 0x10d   :  { %611 = vst [vmem:[#allocation3 + $0xc] sm:$0x3] %v607_v24 }
 0x10e   :  { %v529_v53 = vpop.f32.mrf.mxu1 }
 0x10f   :  { %v530_v54 = vadd.f32 %v3917_v13, %v529_v53 }
 0x110   :  { %v3261_v55 = vpop.f32.mrf.mxu1 }
 0x111   :  { %534 = vst [vmem:[#allocation3 + $0xa] sm:$0x3] %v530_v54  ;;  %v1106_v55 = vld [vmem:[#allocation3 + $0x8] sm:$0x3] }
 0x112   :  { %v759_v27 = vpop.f32.mrf.mxu0 }
 0x113   :  { %v763_v28 = vadd.f32 %v759_v27, %v689_v26 }
 0x114   :  { %v3294_v29 = vpop.f32.mrf.mxu0 }
 0x115   :  { %3559 = vtanh.f32 %v763_v28  ;;  %v2996_v31 = vmul.f32 -1.442695, %v763_v28 }
 0x117   :  { %3561 = vpow2.f32 %v2996_v31 }
 0x11a   :  { %v683_v56 = vpop.f32.mrf.mxu1 }
 0x11b   :  { %v684_v57 = vadd.f32 %v3917_v13, %v683_v56 }
 0x11c   :  { %v3283_v58 = vpop.f32.mrf.mxu1 }
 0x11d   :  { %688 = vst [vmem:[#allocation3 + $0xe] sm:$0x3] %v684_v57 }
 0x122   :  { %v3560_v30 = vpop.eup %3559 }
 0x123   :  { %773 = vrot.lane.b32.xlu0 %v3560_v30, %s3777_s25 }
 0x124   :  { %v3562_v32 = vpop.eup %3561 }
 0x125   :  { %v767_v33 = vadd.f32 1.0, %v3562_v32 }
 0x127   :  { %3563 = vrcp.f32 %v767_v33 }
 0x134   :  { %v3564_v34 = vpop.eup %3563 }
 0x135   :  { %v771_v37 = vmul.f32 0.0, %v3564_v34 }
 0x195   :  { %v774_v35 = vpop.permute.xlu0 %773 }
 0x196   :  { %v776_v36 = vmul.f32 %v3564_v34, %v774_v35 }
 0x198   :  { %778 = vrot.lane.b32.xlu0 %v776_v36, %s3777_s25 }
 0x20a   :  { %v779_v38 = vpop.permute.xlu0 %778 }
 0x20b   :  { %v3925_v39 = vadd.f32 %v779_v38, %v771_v37  ;;  %v1002_v37 = vld [vmem:[#allocation3 + $0x6] sm:$0x3] }
 0x20d   :  { %3565 = vtanh.f32 %v3925_v39 }
 0x21a   :  { %v3566_v42 = vpop.eup %3565 }
 0x21b   :  { %784 = vrot.lane.b32.xlu1 %v3566_v42, %s3777_s25 }
 0x28d   :  { %v785_v45 = vpop.permute.xlu1 %784 }
 0x28e   :  { %v787_v46 = vmul.f32 %v3564_v34, %v785_v45 }
 0x290   :  { %789 = vrot.lane.b32.xlu1 %v787_v46, %s3782_s7 }
 0x302   :  { %v790_v59 = vpop.permute.xlu1 %789 }
 0x303   :  { %793 = vst.msk [vmem:[#allocation2] sm:$0x3] %vm792_vm2, %v790_v59  ;;  %3304 = vmatmul.mubr.msk.f32.vlgmr.msra.gmra.mxu1 %vm75_vm1, %v790_v59 }
 0x304   :  { %3318 = vmatpush3.msra.mxu1 %v3882_v9  ;;  %3325 = vmatprep.mubr.msk.f32.mxu1 %vm3781_vm0, %v3780_v0 }
 0x305   :  { %3319 = vmatprep.subr.mxu1 %v3780_v0 }
 0x306   :  { %3320 = vmatpush3.msra.mxu1 %v3887_v10 }
 0x307   :  { %3321 = vmatprep.subr.mxu1 %v3780_v0 }
 0x308   :  { %3322 = vmatpush3.msra.mxu1 %v3893_v11 }
 0x309   :  { %3323 = vmatprep.subr.mxu1 %v3780_v0 }
 0x30a   :  { %3324 = vmatpush3.msra.mxu1 %v3897_v12 }
 0x30b   :  { %3339 = vmatprep.subr.mxu1 %v3780_v0 }
 0x3c3   :  { %v863_v61 = vpop.f32.mrf.mxu1 }
 0x3c4   :  { %v867_v62 = vadd.f32 %v863_v61, %v794_v60 }
 0x3c5   :  { %v3305_v63 = vpop.f32.mrf.mxu1 }
 0x3c6   :  { %3567 = vtanh.f32 %v867_v62  ;;  %v2998_v2 = vmul.f32 -1.442695, %v867_v62 }
 0x3c8   :  { %3569 = vpow2.f32 %v2998_v2 }
 0x3d3   :  { %v3568_v1 = vpop.eup %3567 }
 0x3d4   :  { %877 = vrot.lane.b32.xlu0 %v3568_v1, %s3777_s25 }
 0x3d5   :  { %v3570_v3 = vpop.eup %3569 }
 0x3d6   :  { %v871_v4 = vadd.f32 1.0, %v3570_v3 }
 0x3d8   :  { %3571 = vrcp.f32 %v871_v4 }
 0x3e5   :  { %v3572_v5 = vpop.eup %3571 }
 0x3e6   :  { %v875_v8 = vmul.f32 %v3572_v5, %v3925_v39 }
 0x446   :  { %v878_v6 = vpop.permute.xlu0 %877 }
 0x447   :  { %v880_v7 = vmul.f32 %v3572_v5, %v878_v6 }
 0x449   :  { %882 = vrot.lane.b32.xlu1 %v880_v7, %s3777_s25 }
 0x4bb   :  { %v883_v13 = vpop.permute.xlu1 %882 }
 0x4bc   :  { %v885_v14 = vadd.f32 %v883_v13, %v875_v8 }
 0x4be   :  { %3573 = vtanh.f32 %v885_v14 }
 0x4cb   :  { %v3574_v15 = vpop.eup %3573 }
 0x4cc   :  { %888 = vrot.lane.b32.xlu0 %v3574_v15, %s3777_s25 }
 0x53e   :  { %v889_v16 = vpop.permute.xlu0 %888 }
 0x53f   :  { %v891_v17 = vmul.f32 %v3572_v5, %v889_v16 }
 0x541   :  { %893 = vrot.lane.b32.xlu1 %v891_v17, %s3782_s7 }
 0x5b3   :  { %v894_v18 = vpop.permute.xlu1 %893 }
 0x5b4   :  { %897 = vst.msk [vmem:[#allocation2 + $0x2] sm:$0x3] %vm792_vm2, %v894_v18  ;;  %3315 = vmatmul.mubr.msk.f32.vlgmr.msra.gmra.mxu0 %vm75_vm1, %v894_v18 }
 0x5b5   :  { %3329 = vmatpush3.msra.mxu0 %v3882_v9  ;;  %3336 = vmatprep.mubr.msk.f32.mxu0 %vm3781_vm0, %v3780_v0 }
 0x5b6   :  { %3330 = vmatprep.subr.mxu0 %v3780_v0 }
 0x5b7   :  { %3331 = vmatpush3.msra.mxu0 %v3887_v10 }
 0x5b8   :  { %3332 = vmatprep.subr.mxu0 %v3780_v0 }
 0x5b9   :  { %3333 = vmatpush3.msra.mxu0 %v3893_v11 }
 0x5ba   :  { %3334 = vmatprep.subr.mxu0 %v3780_v0 }
 0x5bb   :  { %3335 = vmatpush3.msra.mxu0 %v3897_v12 }
 0x5bc   :  { %3350 = vmatprep.subr.mxu0 %v3780_v0 }
 0x674   :  { %v967_v20 = vpop.f32.mrf.mxu0 }
 0x675   :  { %v971_v21 = vadd.f32 %v967_v20, %v898_v19 }
 0x676   :  { %v3316_v22 = vpop.f32.mrf.mxu0 }
 0x677   :  { %3575 = vtanh.f32 %v971_v21  ;;  %v3000_v24 = vmul.f32 -1.442695, %v971_v21 }
 0x679   :  { %3577 = vpow2.f32 %v3000_v24 }
 0x684   :  { %v3576_v23 = vpop.eup %3575 }
 0x685   :  { %981 = vrot.lane.b32.xlu0 %v3576_v23, %s3777_s25 }
 0x686   :  { %v3578_v25 = vpop.eup %3577 }
 0x687   :  { %v975_v26 = vadd.f32 1.0, %v3578_v25 }
 0x689   :  { %3579 = vrcp.f32 %v975_v26 }
 0x696   :  { %v3580_v27 = vpop.eup %3579 }
 0x697   :  { %v979_v30 = vmul.f32 %v3580_v27, %v885_v14  ;;  %v1210_v14 = vld [vmem:[#allocation3 + $0xa] sm:$0x3] }
 0x6f7   :  { %v982_v28 = vpop.permute.xlu0 %981 }
 0x6f8   :  { %v984_v29 = vmul.f32 %v3580_v27, %v982_v28 }
 0x6fa   :  { %986 = vrot.lane.b32.xlu1 %v984_v29, %s3777_s25  ;;  %v4066_v29 = vld [vmem:[#allocation7 + $0x30] sm:$0xff] }
 0x76c   :  { %v987_v31 = vpop.permute.xlu1 %986 }
 0x76d   :  { %v989_v32 = vadd.f32 %v987_v31, %v979_v30  ;;  %v4072_v30 = vld [vmem:[#allocation7 + $0x28] sm:$0xff]  ;;  %v4076_v31 = vld [vmem:[#allocation7 + $0x20] sm:$0xff] }
 0x76f   :  { %3581 = vtanh.f32 %v989_v32 }
 0x77c   :  { %v3582_v33 = vpop.eup %3581 }
 0x77d   :  { %992 = vrot.lane.b32.xlu0 %v3582_v33, %s3777_s25 }
 0x7ef   :  { %v993_v34 = vpop.permute.xlu0 %992 }
 0x7f0   :  { %v995_v35 = vmul.f32 %v3580_v27, %v993_v34  ;;  %v4062_v27 = vld [vmem:[#allocation7 + $0x38] sm:$0xff] }
 0x7f2   :  { %997 = vrot.lane.b32.xlu1 %v995_v35, %s3782_s7  ;;  %v1314_v35 = vld [vmem:[#allocation3 + $0xc] sm:$0x3] }
 0x864   :  { %v998_v36 = vpop.permute.xlu1 %997 }
 0x865   :  { %1001 = vst.msk [vmem:[#allocation2 + $0x4] sm:$0x3] %vm792_vm2, %v998_v36  ;;  %3326 = vmatmul.mubr.msk.f32.vlgmr.msra.gmra.mxu1 %vm75_vm1, %v998_v36 }
 0x866   :  { %3340 = vmatpush3.msra.mxu1 %v3882_v9  ;;  %3347 = vmatprep.mubr.msk.f32.mxu1 %vm3781_vm0, %v3780_v0 }
 0x867   :  { %3341 = vmatprep.subr.mxu1 %v3780_v0 }
 0x868   :  { %3342 = vmatpush3.msra.mxu1 %v3887_v10 }
 0x869   :  { %3343 = vmatprep.subr.mxu1 %v3780_v0 }
 0x86a   :  { %3344 = vmatpush3.msra.mxu1 %v3893_v11 }
 0x86b   :  { %3345 = vmatprep.subr.mxu1 %v3780_v0 }
 0x86c   :  { %3346 = vmatpush3.msra.mxu1 %v3897_v12  ;;  %v1690_v33 = vld [vmem:[#allocation2 + $0x4] sm:$0x3] }
 0x86d   :  { %3361 = vmatprep.subr.mxu1 %v3780_v0 }
 0x925   :  { %v1071_v38 = vpop.f32.mrf.mxu1 }
 0x926   :  { %v1075_v39 = vadd.f32 %v1071_v38, %v1002_v37 }
 0x927   :  { %v3327_v40 = vpop.f32.mrf.mxu1 }
 0x928   :  { %3583 = vtanh.f32 %v1075_v39  ;;  %v3002_v42 = vmul.f32 -1.442695, %v1075_v39  ;;  %v4118_v39 = vld [vmem:[%s4332_s3 + $0x1] ss:$0 sm:$0xff]  ;;  %s3783_s3 = smov [#allocation10]  }
 0x929   :  { %s2974_s10 = sshll.u32 %s3783_s3, 4  ;;  %s2975_s10 = int_to_ptr.vmem [resolvable:$true] %s2974_s10 }
 0x92a   :  { %3585 = vpow2.f32 %v3002_v42  ;;  %s3747_s11 = scalar_lea.vmem %s2975_s10, 256  ;;  %p3752_p2 = scmp.lt.s32.totalorder %s2975_s10, %s2975_s10 }
 0x92b   :  { %p3748_p1 = scmp.ne.s32.totalorder %s2975_s10, %s3747_s11  ;;  %p3753_p3 = scmp.lt.s32.totalorder %s3747_s11, %s3747_s11 }
 0x92d   :  { %p3754_p4 = por %p3753_p3, %p3752_p2 }
 0x92f   :  { %p3755_p5 = pnand %p3754_p4, %p3748_p1 }
 0x935   :  { %v3584_v41 = vpop.eup %3583 }
 0x936   :  { %1085 = vrot.lane.b32.xlu0 %v3584_v41, %s3777_s25 }
 0x937   :  { %v3586_v43 = vpop.eup %3585 }
 0x938   :  { %v1079_v44 = vadd.f32 1.0, %v3586_v43 }
 0x93a   :  { %3587 = vrcp.f32 %v1079_v44 }
 0x947   :  { %v3588_v45 = vpop.eup %3587 }
 0x948   :  { %v1083_v48 = vmul.f32 %v3588_v45, %v989_v32  ;;  %v1540_v32 = vld [vmem:[#allocation2] sm:$0x3] }
 0x9a8   :  { %v1086_v46 = vpop.permute.xlu0 %1085 }
 0x9a9   :  { %v1088_v47 = vmul.f32 %v3588_v45, %v1086_v46 }
 0x9ab   :  { %1090 = vrot.lane.b32.xlu1 %v1088_v47, %s3777_s25 }
 0xa1d   :  { %v1091_v49 = vpop.permute.xlu1 %1090 }
 0xa1e   :  { %v1093_v50 = vadd.f32 %v1091_v49, %v1083_v48 }
 0xa20   :  { %3589 = vtanh.f32 %v1093_v50 }
 0xa2d   :  { %v3590_v51 = vpop.eup %3589 }
 0xa2e   :  { %1096 = vrot.lane.b32.xlu0 %v3590_v51, %s3777_s25 }
 0xaa0   :  { %v1097_v52 = vpop.permute.xlu0 %1096 }
 0xaa1   :  { %v1099_v53 = vmul.f32 %v3588_v45, %v1097_v52 }
 0xaa3   :  { %1101 = vrot.lane.b32.xlu1 %v1099_v53, %s3782_s7 }
 0xb15   :  { %v1102_v54 = vpop.permute.xlu1 %1101 }
 0xb16   :  { %1105 = vst.msk [vmem:[#allocation2 + $0x6] sm:$0x3] %vm792_vm2, %v1102_v54  ;;  %3337 = vmatmul.mubr.msk.f32.vlgmr.msra.gmra.mxu0 %vm75_vm1, %v1102_v54 }
 0xb17   :  { %3351 = vmatpush3.msra.mxu0 %v3882_v9  ;;  %3358 = vmatprep.mubr.msk.f32.mxu0 %vm3781_vm0, %v3780_v0 }
 0xb18   :  { %3352 = vmatprep.subr.mxu0 %v3780_v0 }
 0xb19   :  { %3353 = vmatpush3.msra.mxu0 %v3887_v10 }
 0xb1a   :  { %3354 = vmatprep.subr.mxu0 %v3780_v0 }
 0xb1b   :  { %3355 = vmatpush3.msra.mxu0 %v3893_v11 }
 0xb1c   :  { %3356 = vmatprep.subr.mxu0 %v3780_v0 }
 0xb1d   :  { %3357 = vmatpush3.msra.mxu0 %v3897_v12 }
 0xb1e   :  { %3372 = vmatprep.subr.mxu0 %v3780_v0 }
 0xbd6   :  { %v1175_v56 = vpop.f32.mrf.mxu0 }
 0xbd7   :  { %v1179_v57 = vadd.f32 %v1175_v56, %v1106_v55 }
 0xbd8   :  { %v3338_v58 = vpop.f32.mrf.mxu0 }
 0xbd9   :  { %3591 = vtanh.f32 %v1179_v57  ;;  %v3004_v60 = vmul.f32 -1.442695, %v1179_v57 }
 0xbdb   :  { %3593 = vpow2.f32 %v3004_v60 }
 0xbe6   :  { %v3592_v59 = vpop.eup %3591 }
 0xbe7   :  { %1189 = vrot.lane.b32.xlu0 %v3592_v59, %s3777_s25 }
 0xbe8   :  { %v3594_v61 = vpop.eup %3593 }
 0xbe9   :  { %v1183_v62 = vadd.f32 1.0, %v3594_v61 }
 0xbeb   :  { %3595 = vrcp.f32 %v1183_v62 }
 0xbf8   :  { %v3596_v63 = vpop.eup %3595 }
 0xbf9   :  { %v1187_v3 = vmul.f32 %v3596_v63, %v1093_v50 }
 0xc59   :  { %v1190_v1 = vpop.permute.xlu0 %1189 }
 0xc5a   :  { %v1192_v2 = vmul.f32 %v3596_v63, %v1190_v1 }
 0xc5c   :  { %1194 = vrot.lane.b32.xlu1 %v1192_v2, %s3777_s25  ;;  %v4142_v2 = vld [vmem:[#allocation9 + $0x38] sm:$0xff] }
 0xcce   :  { %v1195_v4 = vpop.permute.xlu1 %1194 }
 0xccf   :  { %v1197_v5 = vadd.f32 %v1195_v4, %v1187_v3  ;;  %v4148_v3 = vld [vmem:[#allocation9 + $0x30] sm:$0xff]  ;;  %v4154_v4 = vld [vmem:[#allocation9 + $0x28] sm:$0xff] }
 0xcd1   :  { %3597 = vtanh.f32 %v1197_v5 }
 0xcde   :  { %v3598_v6 = vpop.eup %3597 }
 0xcdf   :  { %1200 = vrot.lane.b32.xlu0 %v3598_v6, %s3777_s25  ;;  %v1765_v6 = vld [vmem:[#allocation2 + $0x6] sm:$0x3] }
 0xd51   :  { %v1201_v7 = vpop.permute.xlu0 %1200 }
 0xd52   :  { %v1203_v8 = vmul.f32 %v3596_v63, %v1201_v7  ;;  %v1615_v63 = vld [vmem:[#allocation2 + $0x2] sm:$0x3] }
 0xd54   :  { %1205 = vrot.lane.b32.xlu1 %v1203_v8, %s3782_s7  ;;  %v1418_v8 = vld [vmem:[#allocation3 + $0xe] sm:$0x3] }
 0xdc6   :  { %v1206_v13 = vpop.permute.xlu1 %1205 }
 0xdc7   :  { %1209 = vst.msk [vmem:[#allocation2 + $0x8] sm:$0x3] %vm792_vm2, %v1206_v13  ;;  %3348 = vmatmul.mubr.msk.f32.vlgmr.msra.gmra.mxu1 %vm75_vm1, %v1206_v13 }
 0xdc8   :  { %3362 = vmatpush3.msra.mxu1 %v3882_v9  ;;  %3369 = vmatprep.mubr.msk.f32.mxu1 %vm3781_vm0, %v3780_v0 }
 0xdc9   :  { %3363 = vmatprep.subr.mxu1 %v3780_v0 }
 0xdca   :  { %3364 = vmatpush3.msra.mxu1 %v3887_v10 }
 0xdcb   :  { %3365 = vmatprep.subr.mxu1 %v3780_v0 }
 0xdcc   :  { %3366 = vmatpush3.msra.mxu1 %v3893_v11 }
 0xdcd   :  { %3367 = vmatprep.subr.mxu1 %v3780_v0 }
 0xdce   :  { %3368 = vmatpush3.msra.mxu1 %v3897_v12  ;;  %v1840_v34 = vld [vmem:[#allocation2 + $0x8] sm:$0x3] }
 0xdcf   :  { %3383 = vmatprep.subr.mxu1 %v3780_v0 }
 0xe87   :  { %v1279_v15 = vpop.f32.mrf.mxu1 }
 0xe88   :  { %v1283_v9 = vadd.f32 %v1279_v15, %v1210_v14 }
 0xe89   :  { %v3349_v16 = vpop.f32.mrf.mxu1 }
 0xe8a   :  { %3599 = vtanh.f32 %v1283_v9  ;;  %v3006_v18 = vmul.f32 -1.442695, %v1283_v9 }
 0xe8c   :  { %3601 = vpow2.f32 %v3006_v18 }
 0xe97   :  { %v3600_v17 = vpop.eup %3599 }
 0xe98   :  { %1293 = vrot.lane.b32.xlu0 %v3600_v17, %s3777_s25 }
 0xe99   :  { %v3602_v10 = vpop.eup %3601 }
 0xe9a   :  { %v1287_v19 = vadd.f32 1.0, %v3602_v10 }
 0xe9c   :  { %3603 = vrcp.f32 %v1287_v19 }
 0xea9   :  { %v3604_v11 = vpop.eup %3603 }
 0xeaa   :  { %v1291_v12 = vmul.f32 %v3604_v11, %v1197_v5  ;;  %v4160_v5 = vld [vmem:[#allocation9 + $0x20] sm:$0xff] }
 0xf0a   :  { %v1294_v20 = vpop.permute.xlu0 %1293 }
 0xf0b   :  { %v1296_v21 = vmul.f32 %v3604_v11, %v1294_v20 }
 0xf0d   :  { %1298 = vrot.lane.b32.xlu1 %v1296_v21, %s3777_s25 }
 0xf7f   :  { %v1299_v22 = vpop.permute.xlu1 %1298 }
 0xf80   :  { %v4057_v23 = vadd.f32 %v1299_v22, %v1291_v12 }
 0xf82   :  { %3605 = vtanh.f32 %v4057_v23 }
 0xf8f   :  { %v3606_v24 = vpop.eup %3605 }
 0xf90   :  { %1304 = vrot.lane.b32.xlu0 %v3606_v24, %s3777_s25 }
0x1002   :  { %v1305_v25 = vpop.permute.xlu0 %1304 }
0x1003   :  { %v1307_v26 = vmul.f32 %v3604_v11, %v1305_v25 }
0x1005   :  { %1309 = vrot.lane.b32.xlu1 %v1307_v26, %s3782_s7 }
0x1077   :  { %v1310_v28 = vpop.permute.xlu1 %1309 }
0x1078   :  { %1313 = vst.msk [vmem:[#allocation2 + $0xa] sm:$0x3] %vm792_vm2, %v1310_v28  ;;  %3359 = vmatmul.mubr.msk.f32.vlgmr.msra.gmra.mxu0 %vm75_vm1, %v1310_v28 }
0x1079   :  { %3373 = vmatpush3.msra.mxu0 %v4062_v27  ;;  %3380 = vmatprep.mubr.msk.f32.mxu0 %vm3781_vm0, %v3780_v0 }
0x107a   :  { %3374 = vmatprep.subr.mxu0 %v3780_v0 }
0x107b   :  { %3375 = vmatpush3.msra.mxu0 %v4066_v29 }
0x107c   :  { %3376 = vmatprep.subr.mxu0 %v3780_v0 }
0x107d   :  { %3377 = vmatpush3.msra.mxu0 %v4072_v30 }
0x107e   :  { %3378 = vmatprep.subr.mxu0 %v3780_v0 }
0x107f   :  { %3379 = vmatpush3.msra.mxu0 %v4076_v31  ;;  %v1915_v7 = vld [vmem:[#allocation2 + $0xa] sm:$0x3] }
0x1080   :  { %3381 = vmatmul.mubr.msk.f32.vlgmr.msra.gmra.mxu0 %vm75_vm1, %v1540_v32  ;;  %3394 = vmatprep.subr.mxu0 %v3780_v0 }
0x1081   :  { %3395 = vmatpush3.msra.mxu0 %v4062_v27  ;;  %3402 = vmatprep.mubr.msk.f32.mxu0 %vm3781_vm0, %v3780_v0 }
0x1082   :  { %3396 = vmatprep.subr.mxu0 %v3780_v0 }
0x1083   :  { %3397 = vmatpush3.msra.mxu0 %v4066_v29 }
0x1084   :  { %3398 = vmatprep.subr.mxu0 %v3780_v0 }
0x1085   :  { %3399 = vmatpush3.msra.mxu0 %v4072_v30 }
0x1086   :  { %3400 = vmatprep.subr.mxu0 %v3780_v0 }
0x1087   :  { %3401 = vmatpush3.msra.mxu0 %v4076_v31 }
0x1088   :  { %3403 = vmatmul.mubr.msk.f32.vlgmr.msra.gmra.mxu0 %vm75_vm1, %v1690_v33  ;;  %3416 = vmatprep.subr.mxu0 %v3780_v0 }
0x1089   :  { %3417 = vmatpush3.msra.mxu0 %v4062_v27  ;;  %3424 = vmatprep.mubr.msk.f32.mxu0 %vm3781_vm0, %v3780_v0 }
0x108a   :  { %3418 = vmatprep.subr.mxu0 %v3780_v0 }
0x108b   :  { %3419 = vmatpush3.msra.mxu0 %v4066_v29 }
0x108c   :  { %3420 = vmatprep.subr.mxu0 %v3780_v0 }
0x108d   :  { %3421 = vmatpush3.msra.mxu0 %v4072_v30 }
0x108e   :  { %3422 = vmatprep.subr.mxu0 %v3780_v0 }
0x108f   :  { %3423 = vmatpush3.msra.mxu0 %v4076_v31 }
0x1090   :  { %3425 = vmatmul.mubr.msk.f32.vlgmr.msra.gmra.mxu0 %vm75_vm1, %v1840_v34  ;;  %3438 = vmatprep.subr.mxu0 %v3780_v0 }
0x1091   :  { %3439 = vmatpush3.msra.mxu0 %v4062_v27  ;;  %3446 = vmatprep.mubr.msk.f32.mxu0 %vm3781_vm0, %v3780_v0 }
0x1092   :  { %3440 = vmatprep.subr.mxu0 %v3780_v0 }
0x1093   :  { %3441 = vmatpush3.msra.mxu0 %v4066_v29 }
0x1094   :  { %3442 = vmatprep.subr.mxu0 %v3780_v0 }
0x1095   :  { %3443 = vmatpush3.msra.mxu0 %v4072_v30 }
0x1096   :  { %3444 = vmatprep.subr.mxu0 %v3780_v0 }
0x1097   :  { %3445 = vmatpush3.msra.mxu0 %v4076_v31 }
0x1098   :  { %3460 = vmatprep.subr.mxu0 %v3780_v0 }
0x1138   :  { %v1383_v36 = vpop.f32.mrf.mxu0 }
0x1139   :  { %v1387_v37 = vadd.f32 %v1383_v36, %v1314_v35 }
0x113a   :  { %v3360_v38 = vpop.f32.mrf.mxu0 }
0x113b   :  { %3607 = vtanh.f32 %v1387_v37  ;;  %v3008_v50 = vmul.f32 -1.442695, %v1387_v37 }
0x113d   :  { %3609 = vpow2.f32 %v3008_v50 }
0x1140   :  { %v1610_v40 = vpop.f32.mrf.mxu0 }
0x1141   :  { %v1611_v41 = vadd.f32 %v4118_v39, %v1610_v40 }
0x1142   :  { %v3382_v42 = vpop.f32.mrf.mxu0 }
0x1143   :  { %1614 = vst [vmem:[#allocation3] sm:$0x3] %v1611_v41 }
0x1148   :  { %v3608_v43 = vpop.eup %3607  ;;  %v1760_v44 = vpop.f32.mrf.mxu0 }
0x1149   :  { %v1761_v45 = vadd.f32 %v4118_v39, %v1760_v44  ;;  %1397 = vrot.lane.b32.xlu0 %v3608_v43, %s3777_s25 }
0x114a   :  { %v3404_v46 = vpop.f32.mrf.mxu0  ;;  %v3610_v51 = vpop.eup %3609  ;;  %v2140_v12 = vld [vmem:[#allocation3] sm:$0x3] }
0x114b   :  { %1764 = vst [vmem:[#allocation3 + $0x4] sm:$0x3] %v1761_v45  ;;  %v1391_v52 = vadd.f32 1.0, %v3610_v51 }
0x114d   :  { %3611 = vrcp.f32 %v1391_v52 }
0x1150   :  { %v1910_v47 = vpop.f32.mrf.mxu0 }
0x1151   :  { %v1911_v48 = vadd.f32 %v4118_v39, %v1910_v47 }
0x1152   :  { %v3426_v49 = vpop.f32.mrf.mxu0 }
0x1153   :  { %1914 = vst [vmem:[#allocation3 + $0x8] sm:$0x3] %v1911_v48 }
0x115a   :  { %v3612_v53 = vpop.eup %3611 }
0x115b   :  { %v1395_v56 = vmul.f32 %v3612_v53, %v4057_v23 }
0x11bb   :  { %v1398_v54 = vpop.permute.xlu0 %1397 }
0x11bc   :  { %v1400_v55 = vmul.f32 %v3612_v53, %v1398_v54 }
0x11be   :  { %1402 = vrot.lane.b32.xlu1 %v1400_v55, %s3777_s25 }
0x1230   :  { %v1403_v57 = vpop.permute.xlu1 %1402 }
0x1231   :  { %v4126_v58 = vadd.f32 %v1403_v57, %v1395_v56 }
0x1233   :  { %3613 = vtanh.f32 %v4126_v58 }
0x1240   :  { %v3614_v59 = vpop.eup %3613 }
0x1241   :  { %1408 = vrot.lane.b32.xlu0 %v3614_v59, %s3777_s25 }
0x12b3   :  { %v1409_v60 = vpop.permute.xlu0 %1408 }
0x12b4   :  { %v1411_v61 = vmul.f32 %v3612_v53, %v1409_v60 }
0x12b6   :  { %1413 = vrot.lane.b32.xlu1 %v1411_v61, %s3782_s7 }
0x1328   :  { %v1414_v62 = vpop.permute.xlu1 %1413 }
0x1329   :  { %1417 = vst.msk [vmem:[#allocation2 + $0xc] sm:$0x3] %vm792_vm2, %v1414_v62  ;;  %3370 = vmatmul.mubr.msk.f32.vlgmr.msra.gmra.mxu1 %vm75_vm1, %v1414_v62 }
0x132a   :  { %3384 = vmatpush3.msra.mxu1 %v4062_v27  ;;  %3391 = vmatprep.mubr.msk.f32.mxu1 %vm3781_vm0, %v3780_v0 }
0x132b   :  { %3385 = vmatprep.subr.mxu1 %v3780_v0 }
0x132c   :  { %3386 = vmatpush3.msra.mxu1 %v4066_v29 }
0x132d   :  { %3387 = vmatprep.subr.mxu1 %v3780_v0 }
0x132e   :  { %3388 = vmatpush3.msra.mxu1 %v4072_v30 }
0x132f   :  { %3389 = vmatprep.subr.mxu1 %v3780_v0 }
0x1330   :  { %3390 = vmatpush3.msra.mxu1 %v4076_v31  ;;  %v1990_v1 = vld [vmem:[#allocation2 + $0xc] sm:$0x3] }
0x1331   :  { %3392 = vmatmul.mubr.msk.f32.vlgmr.msra.gmra.mxu1 %vm75_vm1, %v1615_v63  ;;  %3405 = vmatprep.subr.mxu1 %v3780_v0 }
0x1332   :  { %3406 = vmatpush3.msra.mxu1 %v4062_v27  ;;  %3447 = vmatmul.mubr.msk.f32.vlgmr.msra.gmra.mxu0 %vm75_vm1, %v1990_v1 }
0x1333   :  { %3461 = vmatpush3.msra.mxu0 %v4142_v2  ;;  %3407 = vmatprep.subr.mxu1 %v3780_v0 }
0x1334   :  { %3462 = vmatprep.subr.mxu0 %v3780_v0  ;;  %3408 = vmatpush3.msra.mxu1 %v4066_v29 }
0x1335   :  { %3463 = vmatpush3.msra.mxu0 %v4148_v3  ;;  %3409 = vmatprep.subr.mxu1 %v3780_v0 }
0x1336   :  { %3464 = vmatprep.subr.mxu0 %v3780_v0  ;;  %3410 = vmatpush3.msra.mxu1 %v4072_v30 }
0x1337   :  { %3465 = vmatpush3.msra.mxu0 %v4154_v4  ;;  %3411 = vmatprep.subr.mxu1 %v3780_v0 }
0x1338   :  { %3466 = vmatprep.subr.mxu0 %v3780_v0  ;;  %3412 = vmatpush3.msra.mxu1 %v4076_v31 }
0x1339   :  { %3413 = vmatprep.mubr.msk.f32.mxu1 %vm3781_vm0, %v3780_v0  ;;  %3467 = vmatpush3.msra.mxu0 %v4160_v5 }
0x133a   :  { %3468 = vmatprep.mubr.msk.f32.mxu0 %vm3781_vm0, %v3780_v0  ;;  %3414 = vmatmul.mubr.msk.f32.vlgmr.msra.gmra.mxu1 %vm75_vm1, %v1765_v6 }
0x133b   :  { %3427 = vmatprep.subr.mxu1 %v3780_v0  ;;  %3469 = vmatmul.mubr.f32.vlgmr.msra.gmra.mxu0 %v3780_v0 }
0x133c   :  { %3428 = vmatpush3.msra.mxu1 %v4062_v27  ;;  %3435 = vmatprep.mubr.msk.f32.mxu1 %vm3781_vm0, %v3780_v0 }
0x133d   :  { %3429 = vmatprep.subr.mxu1 %v3780_v0  ;;  %3482 = vmatprep.subr.mxu0 %v3780_v0 }
0x133e   :  { %3430 = vmatpush3.msra.mxu1 %v4066_v29  ;;  %3483 = vmatpush3.msra.mxu0 %v4142_v2 }
0x133f   :  { %3431 = vmatprep.subr.mxu1 %v3780_v0  ;;  %3484 = vmatprep.subr.mxu0 %v3780_v0 }
0x1340   :  { %3432 = vmatpush3.msra.mxu1 %v4072_v30  ;;  %3485 = vmatpush3.msra.mxu0 %v4148_v3 }
0x1341   :  { %3433 = vmatprep.subr.mxu1 %v3780_v0  ;;  %3486 = vmatprep.subr.mxu0 %v3780_v0 }
0x1342   :  { %3434 = vmatpush3.msra.mxu1 %v4076_v31  ;;  %3487 = vmatpush3.msra.mxu0 %v4154_v4 }
0x1343   :  { %3436 = vmatmul.mubr.msk.f32.vlgmr.msra.gmra.mxu1 %vm75_vm1, %v1915_v7  ;;  %3449 = vmatprep.subr.mxu1 %v3780_v0 }
0x1344   :  { %3450 = vmatpush3.msra.mxu1 %v4062_v27  ;;  %3457 = vmatprep.mubr.msk.f32.mxu1 %vm3781_vm0, %v3780_v0 }
0x1345   :  { %3451 = vmatprep.subr.mxu1 %v3780_v0  ;;  %3488 = vmatprep.subr.mxu0 %v3780_v0 }
0x1346   :  { %3452 = vmatpush3.msra.mxu1 %v4066_v29  ;;  %3489 = vmatpush3.msra.mxu0 %v4160_v5 }
0x1347   :  { %3453 = vmatprep.subr.mxu1 %v3780_v0  ;;  %3490 = vmatprep.mubr.msk.f32.mxu0 %vm3781_vm0, %v3780_v0 }
0x1348   :  { %3454 = vmatpush3.msra.mxu1 %v4072_v30  ;;  %3504 = vmatprep.subr.mxu0 %v3780_v0 }
0x1349   :  { %3455 = vmatprep.subr.mxu1 %v3780_v0 }
0x134a   :  { %3456 = vmatpush3.msra.mxu1 %v4076_v31 }
0x134b   :  { %3471 = vmatprep.subr.mxu1 %v3780_v0 }
0x13e9   :  { %v1487_v13 = vpop.f32.mrf.mxu1 }
0x13ea   :  { %v1491_v14 = vadd.f32 %v1487_v13, %v1418_v8 }
0x13eb   :  { %v3371_v15 = vpop.f32.mrf.mxu1 }
0x13ec   :  { %3615 = vtanh.f32 %v1491_v14  ;;  %v3010_v30 = vmul.f32 -1.442695, %v1491_v14 }
0x13f1   :  { %v1685_v9 = vpop.f32.mrf.mxu1 }
0x13f2   :  { %v1686_v16 = vadd.f32 %v4118_v39, %v1685_v9  ;;  %v2060_v17 = vpop.f32.mrf.mxu0 }
0x13f3   :  { %v2061_v18 = vadd.f32 %v4118_v39, %v2060_v17  ;;  %v3393_v10 = vpop.f32.mrf.mxu1 }
0x13f4   :  { %1689 = vst [vmem:[#allocation3 + $0x2] sm:$0x3] %v1686_v16  ;;  %v3448_v19 = vpop.f32.mrf.mxu0 }
0x13f5   :  { %2064 = vst [vmem:[#allocation3 + $0xc] sm:$0x3] %v2061_v18 }
0x13f9   :  { %v3616_v11 = vpop.eup %3615 }
0x13fa   :  { %v1835_v20 = vpop.f32.mrf.mxu1  ;;  %1501 = vrot.lane.b32.xlu0 %v3616_v11, %s3777_s25 }
0x13fb   :  { %v1836_v21 = vadd.f32 %v4118_v39, %v1835_v20  ;;  %v2207_v22 = vpop.f32.mrf.mxu0  ;;  %v2241_v61 = vld [vmem:[#allocation3 + $0x2] sm:$0x3]  ;;  %v2345_v20 = vld [vmem:[#allocation3 + $0x4] sm:$0x3] }
0x13fc   :  { %v2211_v23 = vadd.f32 %v2207_v22, %v2140_v12  ;;  %v3415_v24 = vpop.f32.mrf.mxu1 }
0x13fd   :  { %1839 = vst [vmem:[#allocation3 + $0x6] sm:$0x3] %v1836_v21  ;;  %v3470_v25 = vpop.f32.mrf.mxu0 }
0x13fe   :  { %3617 = vtanh.f32 %v2211_v23  ;;  %v3021_v32 = vmul.f32 -1.442695, %v2211_v23 }
0x13ff   :  { %3619 = vpow2.f32 %v3010_v30 }
0x1400   :  { %3621 = vpow2.f32 %v3021_v32 }
0x1403   :  { %v1985_v26 = vpop.f32.mrf.mxu1 }
0x1404   :  { %v1986_v27 = vadd.f32 %v4118_v39, %v1985_v26 }
0x1405   :  { %v3437_v28 = vpop.f32.mrf.mxu1 }
0x1406   :  { %1989 = vst [vmem:[#allocation3 + $0xa] sm:$0x3] %v1986_v27 }
0x140b   :  { %v3618_v29 = vpop.eup %3617 }
0x140c   :  { %2221 = vrot.lane.b32.xlu1 %v3618_v29, %s3777_s25  ;;  %v3620_v31 = vpop.eup %3619 }
0x140d   :  { %v1495_v33 = vadd.f32 1.0, %v3620_v31  ;;  %v3622_v34 = vpop.eup %3621 }
0x140e   :  { %v2215_v38 = vadd.f32 1.0, %v3622_v34 }
0x140f   :  { %3623 = vrcp.f32 %v1495_v33 }
0x1410   :  { %3625 = vrcp.f32 %v2215_v38 }
0x141c   :  { %v3624_v35 = vpop.eup %3623 }
0x141d   :  { %v3626_v40 = vpop.eup %3625  ;;  %v1499_v43 = vmul.f32 %v3624_v35, %v4126_v58 }
0x141e   :  { %v2219_v47 = vmul.f32 0.0, %v3626_v40 }
0x146c   :  { %v1502_v36 = vpop.permute.xlu0 %1501 }
0x146d   :  { %v1504_v37 = vmul.f32 %v3624_v35, %v1502_v36 }
0x146f   :  { %1506 = vrot.lane.b32.xlu0 %v1504_v37, %s3777_s25  ;;  %v2449_v37 = vld [vmem:[#allocation3 + $0x6] sm:$0x3] }
0x147e   :  { %v2222_v41 = vpop.permute.xlu1 %2221 }
0x147f   :  { %v2224_v42 = vmul.f32 %v3626_v40, %v2222_v41 }
0x1481   :  { %2226 = vrot.lane.b32.xlu1 %v2224_v42, %s3777_s25 }
0x14e1   :  { %v1507_v44 = vpop.permute.xlu0 %1506 }
0x14e2   :  { %v1509_v45 = vadd.f32 %v1507_v44, %v1499_v43 }
0x14e4   :  { %3627 = vtanh.f32 %v1509_v45 }
0x14f1   :  { %v3628_v46 = vpop.eup %3627 }
0x14f2   :  { %1512 = vrot.lane.b32.xlu0 %v3628_v46, %s3777_s25 }
0x14f3   :  { %v2227_v48 = vpop.permute.xlu1 %2226 }
0x14f4   :  { %v2229_v49 = vadd.f32 %v2227_v48, %v2219_v47 }
0x14f6   :  { %3629 = vtanh.f32 %v2229_v49 }
0x1503   :  { %v3630_v50 = vpop.eup %3629 }
0x1504   :  { %2232 = vrot.lane.b32.xlu1 %v3630_v50, %s3777_s25 }
0x1564   :  { %v1513_v51 = vpop.permute.xlu0 %1512 }
0x1565   :  { %v1515_v52 = vmul.f32 %v3624_v35, %v1513_v51 }
0x1567   :  { %1517 = vrot.lane.b32.xlu0 %v1515_v52, %s3782_s7 }
0x1576   :  { %v2233_v53 = vpop.permute.xlu1 %2232 }
0x1577   :  { %v2235_v54 = vmul.f32 %v3626_v40, %v2233_v53 }
0x1579   :  { %2237 = vrot.lane.b32.xlu1 %v2235_v54, %s3782_s7 }
0x15d9   :  { %v1518_v55 = vpop.permute.xlu0 %1517 }
0x15da   :  { %1521 = vst.msk [vmem:[#allocation2 + $0xe] sm:$0x3] %vm792_vm2, %v1518_v55 }
0x15e1   :  { %v2065_v56 = vld [vmem:[#allocation2 + $0xe] sm:$0x3] }
0x15e2   :  { %3458 = vmatmul.mubr.msk.f32.vlgmr.msra.gmra.mxu1 %vm75_vm1, %v2065_v56  ;;  %v2553_v56 = vld [vmem:[#allocation3 + $0x8] sm:$0x3] }
0x15e3   :  { %3472 = vmatpush3.msra.mxu1 %v4142_v2  ;;  %3479 = vmatprep.mubr.msk.f32.mxu1 %vm3781_vm0, %v3780_v0 }
0x15e4   :  { %3473 = vmatprep.subr.mxu1 %v3780_v0 }
0x15e5   :  { %3474 = vmatpush3.msra.mxu1 %v4148_v3 }
0x15e6   :  { %3475 = vmatprep.subr.mxu1 %v3780_v0 }
0x15e7   :  { %3476 = vmatpush3.msra.mxu1 %v4154_v4 }
0x15e8   :  { %3477 = vmatprep.subr.mxu1 %v3780_v0 }
0x15e9   :  { %3478 = vmatpush3.msra.mxu1 %v4160_v5 }
0x15ea   :  { %3493 = vmatprep.subr.mxu1 %v3780_v0 }
0x15eb   :  { %v2238_v57 = vpop.permute.xlu1 %2237 }
0x15ec   :  { %2240 = vst.msk [vmem:[#allocation10] sm:$0x3] %vm792_vm2, %v2238_v57  ;;  %3480 = vmatmul.mubr.msk.f32.vlgmr.msra.gmra.mxu1 %vm75_vm1, %v2238_v57 }
0x15ed   :  { %3494 = vmatpush3.msra.mxu1 %v4142_v2  ;;  %3501 = vmatprep.mubr.msk.f32.mxu1 %vm3781_vm0, %v3780_v0 }
0x15ee   :  { %3495 = vmatprep.subr.mxu1 %v3780_v0 }
0x15ef   :  { %3496 = vmatpush3.msra.mxu1 %v4148_v3 }
0x15f0   :  { %3497 = vmatprep.subr.mxu1 %v3780_v0 }
0x15f1   :  { %3498 = vmatpush3.msra.mxu1 %v4154_v4 }
0x15f2   :  { %3499 = vmatprep.subr.mxu1 %v3780_v0 }
0x15f3   :  { %3500 = vmatpush3.msra.mxu1 %v4160_v5 }
0x15f4   :  { %3515 = vmatprep.subr.mxu1 %v3780_v0 }
0x16a2   :  { %v2135_v58 = vpop.f32.mrf.mxu1 }
0x16a3   :  { %v2136_v59 = vadd.f32 %v4118_v39, %v2135_v58 }
0x16a4   :  { %v3459_v60 = vpop.f32.mrf.mxu1 }
0x16a5   :  { %2139 = vst [vmem:[#allocation3 + $0xe] sm:$0x3] %v2136_v59 }
0x16ac   :  { %v2310_v62 = vpop.f32.mrf.mxu1 }
0x16ad   :  { %v2314_v63 = vadd.f32 %v2310_v62, %v2241_v61 }
0x16ae   :  { %v3481_v1 = vpop.f32.mrf.mxu1 }
0x16af   :  { %3631 = vtanh.f32 %v2314_v63  ;;  %v3023_v7 = vmul.f32 -1.442695, %v2314_v63 }
0x16b1   :  { %3633 = vpow2.f32 %v3023_v7 }
0x16bc   :  { %v3632_v6 = vpop.eup %3631 }
0x16bd   :  { %2324 = vrot.lane.b32.xlu0 %v3632_v6, %s3777_s25 }
0x16be   :  { %v3634_v8 = vpop.eup %3633 }
0x16bf   :  { %v2318_v13 = vadd.f32 1.0, %v3634_v8 }
0x16c1   :  { %3635 = vrcp.f32 %v2318_v13 }
0x16ce   :  { %v3636_v14 = vpop.eup %3635 }
0x16cf   :  { %v2322_v39 = vmul.f32 %v3636_v14, %v2229_v49 }
0x172f   :  { %v2325_v15 = vpop.permute.xlu0 %2324 }
0x1730   :  { %v2327_v9 = vmul.f32 %v3636_v14, %v2325_v15 }
0x1732   :  { %2329 = vrot.lane.b32.xlu1 %v2327_v9, %s3777_s25 }
0x17a4   :  { %v2330_v16 = vpop.permute.xlu1 %2329 }
0x17a5   :  { %v2332_v17 = vadd.f32 %v2330_v16, %v2322_v39 }
0x17a7   :  { %3637 = vtanh.f32 %v2332_v17 }
0x17b4   :  { %v3638_v18 = vpop.eup %3637 }
0x17b5   :  { %2335 = vrot.lane.b32.xlu0 %v3638_v18, %s3777_s25 }
0x1827   :  { %v2336_v10 = vpop.permute.xlu0 %2335 }
0x1828   :  { %v2338_v19 = vmul.f32 %v3636_v14, %v2336_v10 }
0x182a   :  { %2340 = vrot.lane.b32.xlu1 %v2338_v19, %s3782_s7 }
0x189c   :  { %v2341_v11 = vpop.permute.xlu1 %2340 }
0x189d   :  { %2344 = vst.msk [vmem:[#allocation10 + $0x2] sm:$0x3] %vm792_vm2, %v2341_v11  ;;  %3491 = vmatmul.mubr.msk.f32.vlgmr.msra.gmra.mxu0 %vm75_vm1, %v2341_v11 }
0x189e   :  { %3505 = vmatpush3.msra.mxu0 %v4142_v2  ;;  %3512 = vmatprep.mubr.msk.f32.mxu0 %vm3781_vm0, %v3780_v0 }
0x189f   :  { %3506 = vmatprep.subr.mxu0 %v3780_v0 }
0x18a0   :  { %3507 = vmatpush3.msra.mxu0 %v4148_v3 }
0x18a1   :  { %3508 = vmatprep.subr.mxu0 %v3780_v0 }
0x18a2   :  { %3509 = vmatpush3.msra.mxu0 %v4154_v4 }
0x18a3   :  { %3510 = vmatprep.subr.mxu0 %v3780_v0 }
0x18a4   :  { %3511 = vmatpush3.msra.mxu0 %v4160_v5 }
0x18a5   :  { %3526 = vmatprep.subr.mxu0 %v3780_v0 }
0x195d   :  { %v2414_v21 = vpop.f32.mrf.mxu0 }
0x195e   :  { %v2418_v12 = vadd.f32 %v2414_v21, %v2345_v20 }
0x195f   :  { %v3492_v22 = vpop.f32.mrf.mxu0 }
0x1960   :  { %3639 = vtanh.f32 %v2418_v12  ;;  %v3025_v24 = vmul.f32 -1.442695, %v2418_v12 }
0x1962   :  { %3641 = vpow2.f32 %v3025_v24 }
0x196d   :  { %v3640_v23 = vpop.eup %3639 }
0x196e   :  { %2428 = vrot.lane.b32.xlu0 %v3640_v23, %s3777_s25 }
0x196f   :  { %v3642_v25 = vpop.eup %3641 }
0x1970   :  { %v2422_v26 = vadd.f32 1.0, %v3642_v25 }
0x1972   :  { %3643 = vrcp.f32 %v2422_v26 }
0x197f   :  { %v3644_v27 = vpop.eup %3643 }
0x1980   :  { %v2426_v30 = vmul.f32 %v3644_v27, %v2332_v17  ;;  %v2657_v17 = vld [vmem:[#allocation3 + $0xa] sm:$0x3] }
0x19e0   :  { %v2429_v28 = vpop.permute.xlu0 %2428 }
0x19e1   :  { %v2431_v29 = vmul.f32 %v3644_v27, %v2429_v28 }
0x19e3   :  { %2433 = vrot.lane.b32.xlu1 %v2431_v29, %s3777_s25 }
0x1a55   :  { %v2434_v31 = vpop.permute.xlu1 %2433 }
0x1a56   :  { %v2436_v32 = vadd.f32 %v2434_v31, %v2426_v30 }
0x1a58   :  { %3645 = vtanh.f32 %v2436_v32 }
0x1a65   :  { %v3646_v33 = vpop.eup %3645 }
0x1a66   :  { %2439 = vrot.lane.b32.xlu0 %v3646_v33, %s3777_s25 }
0x1ad8   :  { %v2440_v34 = vpop.permute.xlu0 %2439 }
0x1ad9   :  { %v2442_v35 = vmul.f32 %v3644_v27, %v2440_v34  ;;  %v2761_v27 = vld [vmem:[#allocation3 + $0xc] sm:$0x3] }
0x1adb   :  { %2444 = vrot.lane.b32.xlu1 %v2442_v35, %s3782_s7 }
0x1b4d   :  { %v2445_v36 = vpop.permute.xlu1 %2444 }
0x1b4e   :  { %2448 = vst.msk [vmem:[#allocation10 + $0x4] sm:$0x3] %vm792_vm2, %v2445_v36  ;;  %3502 = vmatmul.mubr.msk.f32.vlgmr.msra.gmra.mxu1 %vm75_vm1, %v2445_v36 }
0x1b4f   :  { %3516 = vmatpush3.msra.mxu1 %v4142_v2  ;;  %3523 = vmatprep.mubr.msk.f32.mxu1 %vm3781_vm0, %v3780_v0 }
0x1b50   :  { %3517 = vmatprep.subr.mxu1 %v3780_v0 }
0x1b51   :  { %3518 = vmatpush3.msra.mxu1 %v4148_v3 }
0x1b52   :  { %3519 = vmatprep.subr.mxu1 %v3780_v0 }
0x1b53   :  { %3520 = vmatpush3.msra.mxu1 %v4154_v4 }
0x1b54   :  { %3521 = vmatprep.subr.mxu1 %v3780_v0 }
0x1b55   :  { %3522 = vmatpush3.msra.mxu1 %v4160_v5 }
0x1b56   :  { %3537 = vmatprep.subr.mxu1 %v3780_v0 }
0x1c0e   :  { %v2518_v38 = vpop.f32.mrf.mxu1 }
0x1c0f   :  { %v2522_v40 = vadd.f32 %v2518_v38, %v2449_v37 }
0x1c10   :  { %v3503_v41 = vpop.f32.mrf.mxu1 }
0x1c11   :  { %3647 = vtanh.f32 %v2522_v40  ;;  %v3027_v43 = vmul.f32 -1.442695, %v2522_v40 }
0x1c13   :  { %3649 = vpow2.f32 %v3027_v43 }
0x1c1e   :  { %v3648_v42 = vpop.eup %3647 }
0x1c1f   :  { %2532 = vrot.lane.b32.xlu0 %v3648_v42, %s3777_s25 }
0x1c20   :  { %v3650_v44 = vpop.eup %3649 }
0x1c21   :  { %v2526_v45 = vadd.f32 1.0, %v3650_v44 }
0x1c23   :  { %3651 = vrcp.f32 %v2526_v45 }
0x1c30   :  { %v3652_v46 = vpop.eup %3651 }
0x1c31   :  { %v2530_v49 = vmul.f32 %v3652_v46, %v2436_v32 }
0x1c91   :  { %v2533_v47 = vpop.permute.xlu0 %2532 }
0x1c92   :  { %v2535_v48 = vmul.f32 %v3652_v46, %v2533_v47 }
0x1c94   :  { %2537 = vrot.lane.b32.xlu1 %v2535_v48, %s3777_s25 }
0x1d06   :  { %v2538_v50 = vpop.permute.xlu1 %2537 }
0x1d07   :  { %v2540_v51 = vadd.f32 %v2538_v50, %v2530_v49 }
0x1d09   :  { %3653 = vtanh.f32 %v2540_v51 }
0x1d16   :  { %v3654_v52 = vpop.eup %3653 }
0x1d17   :  { %2543 = vrot.lane.b32.xlu0 %v3654_v52, %s3777_s25 }
0x1d89   :  { %v2544_v53 = vpop.permute.xlu0 %2543 }
0x1d8a   :  { %v2546_v54 = vmul.f32 %v3652_v46, %v2544_v53  ;;  %v2865_v46 = vld [vmem:[#allocation3 + $0xe] sm:$0x3] }
0x1d8c   :  { %2548 = vrot.lane.b32.xlu1 %v2546_v54, %s3782_s7 }
0x1dfe   :  { %v2549_v55 = vpop.permute.xlu1 %2548 }
0x1dff   :  { %2552 = vst.msk [vmem:[#allocation10 + $0x6] sm:$0x3] %vm792_vm2, %v2549_v55  ;;  %3513 = vmatmul.mubr.msk.f32.vlgmr.msra.gmra.mxu0 %vm75_vm1, %v2549_v55 }
0x1e00   :  { %3527 = vmatpush3.msra.mxu0 %v4142_v2  ;;  %3534 = vmatprep.mubr.msk.f32.mxu0 %vm3781_vm0, %v3780_v0 }
0x1e01   :  { %3528 = vmatprep.subr.mxu0 %v3780_v0 }
0x1e02   :  { %3529 = vmatpush3.msra.mxu0 %v4148_v3 }
0x1e03   :  { %3530 = vmatprep.subr.mxu0 %v3780_v0 }
0x1e04   :  { %3531 = vmatpush3.msra.mxu0 %v4154_v4 }
0x1e05   :  { %3532 = vmatprep.subr.mxu0 %v3780_v0 }
0x1e06   :  { %3533 = vmatpush3.msra.mxu0 %v4160_v5 }
0x1ebf   :  { %v2622_v57 = vpop.f32.mrf.mxu0 }
0x1ec0   :  { %v2626_v58 = vadd.f32 %v2622_v57, %v2553_v56 }
0x1ec1   :  { %v3514_v59 = vpop.f32.mrf.mxu0 }
0x1ec2   :  { %3655 = vtanh.f32 %v2626_v58  ;;  %v3029_v61 = vmul.f32 -1.442695, %v2626_v58 }
0x1ec4   :  { %3657 = vpow2.f32 %v3029_v61 }
0x1ecf   :  { %v3656_v60 = vpop.eup %3655 }
0x1ed0   :  { %2636 = vrot.lane.b32.xlu0 %v3656_v60, %s3777_s25 }
0x1ed1   :  { %v3658_v62 = vpop.eup %3657 }
0x1ed2   :  { %v2630_v63 = vadd.f32 1.0, %v3658_v62 }
0x1ed4   :  { %3659 = vrcp.f32 %v2630_v63 }
0x1ee1   :  { %v3660_v1 = vpop.eup %3659 }
0x1ee2   :  { %v2634_v8 = vmul.f32 %v3660_v1, %v2540_v51 }
0x1f42   :  { %v2637_v6 = vpop.permute.xlu0 %2636 }
0x1f43   :  { %v2639_v7 = vmul.f32 %v3660_v1, %v2637_v6 }
0x1f45   :  { %2641 = vrot.lane.b32.xlu1 %v2639_v7, %s3777_s25 }
0x1fb7   :  { %v2642_v13 = vpop.permute.xlu1 %2641 }
0x1fb8   :  { %v2644_v14 = vadd.f32 %v2642_v13, %v2634_v8 }
0x1fba   :  { %3661 = vtanh.f32 %v2644_v14 }
0x1fc7   :  { %v3662_v15 = vpop.eup %3661 }
0x1fc8   :  { %2647 = vrot.lane.b32.xlu0 %v3662_v15, %s3777_s25 }
0x203a   :  { %v2648_v9 = vpop.permute.xlu0 %2647 }
0x203b   :  { %v2650_v39 = vmul.f32 %v3660_v1, %v2648_v9 }
0x203d   :  { %2652 = vrot.lane.b32.xlu1 %v2650_v39, %s3782_s7 }
0x20af   :  { %v2653_v16 = vpop.permute.xlu1 %2652 }
0x20b0   :  { %2656 = vst.msk [vmem:[#allocation10 + $0x8] sm:$0x3] %vm792_vm2, %v2653_v16  ;;  %3524 = vmatmul.mubr.msk.f32.vlgmr.msra.gmra.mxu1 %vm75_vm1, %v2653_v16 }
0x20b1   :  { %3538 = vmatpush3.msra.mxu1 %v4142_v2  ;;  %3545 = vmatprep.mubr.msk.f32.mxu1 %vm3781_vm0, %v3780_v0 }
0x20b2   :  { %3539 = vmatprep.subr.mxu1 %v3780_v0 }
0x20b3   :  { %3540 = vmatpush3.msra.mxu1 %v4148_v3 }
0x20b4   :  { %3541 = vmatprep.subr.mxu1 %v3780_v0 }
0x20b5   :  { %3542 = vmatpush3.msra.mxu1 %v4154_v4 }
0x20b6   :  { %3543 = vmatprep.subr.mxu1 %v3780_v0 }
0x20b7   :  { %3544 = vmatpush3.msra.mxu1 %v4160_v5 }
0x2170   :  { %v2726_v18 = vpop.f32.mrf.mxu1 }
0x2171   :  { %v2730_v10 = vadd.f32 %v2726_v18, %v2657_v17 }
0x2172   :  { %v3525_v19 = vpop.f32.mrf.mxu1 }
0x2173   :  { %3663 = vtanh.f32 %v2730_v10  ;;  %v3031_v11 = vmul.f32 -1.442695, %v2730_v10 }
0x2175   :  { %3665 = vpow2.f32 %v3031_v11 }
0x2180   :  { %v3664_v2 = vpop.eup %3663 }
0x2181   :  { %2740 = vrot.lane.b32.xlu0 %v3664_v2, %s3777_s25 }
0x2182   :  { %v3666_v20 = vpop.eup %3665 }
0x2183   :  { %v2734_v3 = vadd.f32 1.0, %v3666_v20 }
0x2185   :  { %3667 = vrcp.f32 %v2734_v3 }
0x2192   :  { %v3668_v21 = vpop.eup %3667 }
0x2193   :  { %v2738_v0 = vmul.f32 %v3668_v21, %v2644_v14 }
0x21f3   :  { %v2741_v12 = vpop.permute.xlu0 %2740 }
0x21f4   :  { %v2743_v4 = vmul.f32 %v3668_v21, %v2741_v12 }
0x21f6   :  { %2745 = vrot.lane.b32.xlu1 %v2743_v4, %s3777_s25 }
0x2268   :  { %v2746_v5 = vpop.permute.xlu1 %2745 }
0x2269   :  { %v2748_v22 = vadd.f32 %v2746_v5, %v2738_v0 }
0x226b   :  { %3669 = vtanh.f32 %v2748_v22 }
0x2278   :  { %v3670_v23 = vpop.eup %3669 }
0x2279   :  { %2751 = vrot.lane.b32.xlu0 %v3670_v23, %s3777_s25 }
0x22eb   :  { %v2752_v24 = vpop.permute.xlu0 %2751 }
0x22ec   :  { %v2754_v25 = vmul.f32 %v3668_v21, %v2752_v24 }
0x22ee   :  { %2756 = vrot.lane.b32.xlu1 %v2754_v25, %s3782_s7 }
0x2360   :  { %v2757_v26 = vpop.permute.xlu1 %2756 }
0x2361   :  { %2760 = vst.msk [vmem:[#allocation10 + $0xa] sm:$0x3] %vm792_vm2, %v2757_v26  ;;  %3535 = vmatmul.mubr.msk.f32.vlgmr.msra.gmra.mxu0 %vm75_vm1, %v2757_v26 }
0x2421   :  { %v2830_v28 = vpop.f32.mrf.mxu0 }
0x2422   :  { %v2834_v29 = vadd.f32 %v2830_v28, %v2761_v27 }
0x2423   :  { %v3536_v30 = vpop.f32.mrf.mxu0 }
0x2424   :  { %3671 = vtanh.f32 %v2834_v29  ;;  %v3033_v32 = vmul.f32 -1.442695, %v2834_v29 }
0x2426   :  { %3673 = vpow2.f32 %v3033_v32 }
0x2431   :  { %v3672_v31 = vpop.eup %3671 }
0x2432   :  { %2844 = vrot.lane.b32.xlu0 %v3672_v31, %s3777_s25 }
0x2433   :  { %v3674_v33 = vpop.eup %3673 }
0x2434   :  { %v2838_v34 = vadd.f32 1.0, %v3674_v33 }
0x2436   :  { %3675 = vrcp.f32 %v2838_v34 }
0x2443   :  { %v3676_v35 = vpop.eup %3675 }
0x2444   :  { %v2842_v38 = vmul.f32 %v3676_v35, %v2748_v22 }
0x24a4   :  { %v2845_v36 = vpop.permute.xlu0 %2844 }
0x24a5   :  { %v2847_v37 = vmul.f32 %v3676_v35, %v2845_v36 }
0x24a7   :  { %2849 = vrot.lane.b32.xlu1 %v2847_v37, %s3777_s25 }
0x2519   :  { %v2850_v40 = vpop.permute.xlu1 %2849 }
0x251a   :  { %v2852_v41 = vadd.f32 %v2850_v40, %v2842_v38 }
0x251c   :  { %3677 = vtanh.f32 %v2852_v41 }
0x2529   :  { %v3678_v42 = vpop.eup %3677 }
0x252a   :  { %2855 = vrot.lane.b32.xlu0 %v3678_v42, %s3777_s25 }
0x259c   :  { %v2856_v43 = vpop.permute.xlu0 %2855 }
0x259d   :  { %v2858_v44 = vmul.f32 %v3676_v35, %v2856_v43 }
0x259f   :  { %2860 = vrot.lane.b32.xlu1 %v2858_v44, %s3782_s7 }
0x2611   :  { %v2861_v45 = vpop.permute.xlu1 %2860 }
0x2612   :  { %2864 = vst.msk [vmem:[#allocation10 + $0xc] sm:$0x3] %vm792_vm2, %v2861_v45  ;;  %3546 = vmatmul.mubr.msk.f32.vlgmr.msra.gmra.mxu1 %vm75_vm1, %v2861_v45 }
0x26d2   :  { %v2934_v47 = vpop.f32.mrf.mxu1 }
0x26d3   :  { %v2938_v48 = vadd.f32 %v2934_v47, %v2865_v46 }
0x26d4   :  { %v3547_v49 = vpop.f32.mrf.mxu1 }
0x26d5   :  { %3679 = vtanh.f32 %v2938_v48  ;;  %v3035_v51 = vmul.f32 -1.442695, %v2938_v48 }
0x26d7   :  { %3681 = vpow2.f32 %v3035_v51 }
0x26e2   :  { %v3680_v50 = vpop.eup %3679 }
0x26e3   :  { %2948 = vrot.lane.b32.xlu0 %v3680_v50, %s3777_s25 }
0x26e4   :  { %v3682_v52 = vpop.eup %3681 }
0x26e5   :  { %v2942_v53 = vadd.f32 1.0, %v3682_v52 }
0x26e7   :  { %3683 = vrcp.f32 %v2942_v53 }
0x26f4   :  { %v3684_v54 = vpop.eup %3683 }
0x26f5   :  { %v2946_v57 = vmul.f32 %v3684_v54, %v2852_v41 }
0x2755   :  { %v2949_v55 = vpop.permute.xlu0 %2948 }
0x2756   :  { %v2951_v56 = vmul.f32 %v3684_v54, %v2949_v55 }
0x2758   :  { %2953 = vrot.lane.b32.xlu1 %v2951_v56, %s3777_s25 }
0x27ca   :  { %v2954_v58 = vpop.permute.xlu1 %2953 }
0x27cb   :  { %v2956_v59 = vadd.f32 %v2954_v58, %v2946_v57 }
0x27cd   :  { %3685 = vtanh.f32 %v2956_v59 }
0x27da   :  { %v3686_v60 = vpop.eup %3685 }
0x27db   :  { %2959 = vrot.lane.b32.xlu0 %v3686_v60, %s3777_s25 }
0x284d   :  { %v2960_v61 = vpop.permute.xlu0 %2959 }
0x284e   :  { %v2962_v62 = vmul.f32 %v3684_v54, %v2960_v61 }
0x2850   :  { %2964 = vrot.lane.b32.xlu1 %v2962_v62, %s3782_s7 }
0x28c2   :  { %v2965_v63 = vpop.permute.xlu1 %2964 }
0x28c3   :  { %2968 = vst.msk [vmem:[#allocation10 + $0xe] sm:$0x3] %vm792_vm2, %v2965_v63 }
0x28c4   :  { %3758 = shalt.err (!%p3755_p5)
}
0x28c5   :  { %2980 = dma.vmem_to_hbm [thread:$0]  %s2975_s10, 256, %s4333_s4, [#allocation6], %s3777_s25, %s3777_s25, %s3778_s26  }
0x28c6   :  { %3771 = dma.done.wait [#allocation6], 256  }
0x28c7   :  { %3772 = vsyncadd [#allocation6], 4294967040 }
0x28c8   :  { %2984 = vsyncpa [#allocation5], 1 }
0x28c9   :  { %2985 = vsyncpa [#allocation8], 1 }
0x28ca   :  { %2986 = vsyncpa [#allocation6], 1 }

</bundles_post_ra>
